<compile_context>
chip_gen: v7x
topology: tpu7x:2x2x1
jax: 0.10.0
libtpu: 0.0.40
codegen_flags: <defaults>
</compile_context>

<pallas_src>
import functools

import numpy as np
import jax
import jax.numpy as jnp
from jax.experimental import pallas as pl
from jax.experimental.pallas import tpu as pltpu

_MXU_DTYPE = jnp.bfloat16   # MXU operand / activation dtype (f32 accumulation)
_LN_EPS = 1e-5
_MASK_NEG = -1e30


# ----------------------------------------------------------------------------
# helpers: tile pickers, LayerNorm, VMEM budget, single-buffering feature probe
# ----------------------------------------------------------------------------
def _pick_sublane_tile(n, target=256):
    for t in (target, 1024, 512, 256, 128, 64, 32, 16, 8):
        if t <= n and n % t == 0 and t % 8 == 0:
            return t
    return n


def _pick_lane_tile(n, target=512):
    for t in (target, 2048, 1024, 512, 256, 128):
        if t <= n and n % t == 0 and t % 128 == 0:
            return t
    return n


def _layer_norm(y, gamma, beta):
    mu = jnp.mean(y, axis=-1, keepdims=True)
    var = jnp.mean((y - mu) ** 2, axis=-1, keepdims=True)
    return (y - mu) * jax.lax.rsqrt(var + _LN_EPS) * gamma + beta


def _vmem_limit(entries, headroom=1.5):
    """Explicit scoped-VMEM budget from (shape, dtype, n_buffers) entries."""
    est = sum(int(np.prod(s)) * np.dtype(d).itemsize * int(n) for s, d, n in entries)
    est = int(est * headroom) + (1 << 20)
    return int(min(max(est, 32 << 20), 64 << 20))   # stay within v7x physical VMEM


def _probe_single_buffering():
    """Check whether pipeline_mode=pl.Buffered(1) (single-buffered grid-invariant
    operands) is supported by this jax/Mosaic build; fall back gracefully if not."""
    if not hasattr(pl, "Buffered"):
        return False
    try:
        def k(w_ref, x_ref, o_ref):
            o_ref[...] = x_ref[...] + w_ref[...]

        x = jnp.ones((16, 128), jnp.float32)
        w = jnp.ones((8, 128), jnp.float32)
        out = pl.pallas_call(
            k,
            out_shape=jax.ShapeDtypeStruct((16, 128), jnp.float32),
            grid=(2,),
            in_specs=[pl.BlockSpec((8, 128), lambda i: (0, 0),
                                   pipeline_mode=pl.Buffered(1)),
                      pl.BlockSpec((8, 128), lambda i: (i, 0))],
            out_specs=pl.BlockSpec((8, 128), lambda i: (i, 0)),
        )(w, x)
        jax.block_until_ready(out)
        return bool(jnp.allclose(out, 2.0))
    except Exception:          # any construction / lowering failure -> fall back
        return False


_SINGLE_BUFFER = _probe_single_buffering()


def _const_spec(shape, grid_ndim):
    """BlockSpec for grid-invariant operands (weights / bias / LN params):
    single-buffered when supported so large weights are not double-buffered in
    VMEM (matters at real dims on v7x's 64 MiB and v5e's 16 MiB scoped default)."""
    zeros = (0,) * len(shape)
    idx = (lambda i: zeros) if grid_ndim == 1 else (lambda i, j: zeros)
    if _SINGLE_BUFFER:
        return pl.BlockSpec(shape, idx, pipeline_mode=pl.Buffered(1))
    return pl.BlockSpec(shape, idx)


def _weight_buffers():
    return 1 if _SINGLE_BUFFER else 2


# ----------------------------------------------------------------------------
# Kernel 1: fused multi-head attention sub-layer
#   head-batched q/k/v projections -> masked softmax attention -> out projection
#   -> residual -> LayerNorm -> non-pad mask
#   grid = (batch, Lq tiles); weights are head-major (H, D, d_pad), d_pad % 128 == 0
# ----------------------------------------------------------------------------
def _attn_sublayer_kernel(xq_ref, xkv_ref, wq_ref, bq_ref, wk_ref, bk_ref,
                          wv_ref, bv_ref, wo_ref, bo_ref, g_ref, b_ref,
                          kpad_ref, npad_ref, o_ref, *, causal):
    xq = xq_ref[0]                        # (Lq, D)  bf16 (residual)
    xkv = xkv_ref[0]                      # (Lk, D)  bf16
    Lq, D = xq.shape
    Lk = xkv.shape[0]
    H = wq_ref.shape[0]

    # head-batched projections (bf16 MXU operands, f32 accumulation);
    # the 1/sqrt(d_k) softmax scale is already folded into W_q / b_q at init.
    xq_b = jnp.broadcast_to(xq[None], (H, Lq, D))
    xkv_b = jnp.broadcast_to(xkv[None], (H, Lk, D))
    dn_proj = (((2,), (1,)), ((0,), (0,)))
    qh = jax.lax.dot_general(xq_b, wq_ref[...], dn_proj,
                             preferred_element_type=jnp.float32) + bq_ref[...]
    kh = jax.lax.dot_general(xkv_b, wk_ref[...], dn_proj,
                             preferred_element_type=jnp.float32) + bk_ref[...]
    vh = jax.lax.dot_general(xkv_b, wv_ref[...], dn_proj,
                             preferred_element_type=jnp.float32) + bv_ref[...]

    # additive mask bias (masked == -1e30), computed once and shared by all heads
    neg = jnp.where(kpad_ref[0] > 0.5, _MASK_NEG, 0.0)          # (1, Lk) f32
    neg = jnp.broadcast_to(neg, (Lq, Lk))
    if causal:
        q0 = pl.program_id(1) * Lq
        row = q0 + jax.lax.broadcasted_iota(jnp.int32, (Lq, Lk), 0)
        col = jax.lax.broadcasted_iota(jnp.int32, (Lq, Lk), 1)
        neg = jnp.where(col > row, _MASK_NEG, neg)

    # scores / softmax / context, head-batched (H is the MXU batch dim)
    s = jax.lax.dot_general(qh.astype(_MXU_DTYPE), kh.astype(_MXU_DTYPE),
                            (((2,), (2,)), ((0,), (0,))),
                            preferred_element_type=jnp.float32)   # (H, Lq, Lk)
    s = s + neg[None]
    s = s - jnp.max(s, axis=-1, keepdims=True)
    p = jnp.exp(s)
    p = p * pl.reciprocal(jnp.sum(p, axis=-1, keepdims=True), approx=True)
    ctx = jax.lax.dot_general(p.astype(_MXU_DTYPE), vh.astype(_MXU_DTYPE),
                              (((2,), (1,)), ((0,), (0,))),
                              preferred_element_type=jnp.float32)  # (H, Lq, d_pad)

    # output projection folded per head: sum_h ctx_h @ Wo_h   (zero-padded rows
    # of Wo contribute nothing -> exact)
    o = jax.lax.dot_general(ctx.astype(_MXU_DTYPE), wo_ref[...],
                            (((2,), (1,)), ((0,), (0,))),
                            preferred_element_type=jnp.float32)    # (H, Lq, D)
    o = jnp.sum(o, axis=0) + bo_ref[...]

    y = _layer_norm(o + xq.astype(jnp.float32), g_ref[...], b_ref[...]) * npad_ref[0]
    o_ref[0] = y.astype(o_ref.dtype)


def attn_sublayer(xq, xkv, kpad, non_pad, p, *, causal):
    B, Lq, D = xq.shape
    Lk = xkv.shape[1]
    H, _, dp = p["w_q"].shape
    tq = _pick_sublane_tile(Lq, 256)
    wbuf = _weight_buffers()

    vmem = _vmem_limit([
        ((1, tq, D), _MXU_DTYPE, 2), ((1, Lk, D), _MXU_DTYPE, 2),
        ((H, D, dp), _MXU_DTYPE, 3 * wbuf), ((H, 1, dp), jnp.float32, 3 * wbuf),
        ((H, dp, D), _MXU_DTYPE, wbuf), ((1, D), jnp.float32, 3 * wbuf),
        ((1, 1, Lk), jnp.float32, 2), ((1, tq, 1), jnp.float32, 2),
        ((1, tq, D), _MXU_DTYPE, 2),
        # dominant in-kernel intermediates (broadcast activations, q/k/v, scores, ctx)
        ((H, tq, D), jnp.float32, 2), ((H, Lk, D), jnp.float32, 1),
        ((H, tq, dp), jnp.float32, 2), ((H, Lk, dp), jnp.float32, 2),
        ((H, tq, Lk), jnp.float32, 2),
    ])

    kern = functools.partial(_attn_sublayer_kernel, causal=causal)
    return pl.pallas_call(
        kern,
        out_shape=jax.ShapeDtypeStruct((B, Lq, D), _MXU_DTYPE),
        grid=(B, Lq // tq),
        in_specs=[
            pl.BlockSpec((1, tq, D), lambda b, i: (b, i, 0)),     # xq (residual)
            pl.BlockSpec((1, Lk, D), lambda b, i: (b, 0, 0)),     # xkv
            _const_spec((H, D, dp), 2), _const_spec((H, 1, dp), 2),   # Wq, bq
            _const_spec((H, D, dp), 2), _const_spec((H, 1, dp), 2),   # Wk, bk
            _const_spec((H, D, dp), 2), _const_spec((H, 1, dp), 2),   # Wv, bv
            _const_spec((H, dp, D), 2), _const_spec((1, D), 2),       # Wo, bo
            _const_spec((1, D), 2), _const_spec((1, D), 2),           # LN gamma, beta
            pl.BlockSpec((1, 1, Lk), lambda b, i: (b, 0, 0)),     # key-pad mask
            pl.BlockSpec((1, tq, 1), lambda b, i: (b, i, 0)),     # non-pad mask
        ],
        out_specs=pl.BlockSpec((1, tq, D), lambda b, i: (b, i, 0)),
        compiler_params=pltpu.CompilerParams(
            dimension_semantics=("parallel", "parallel"),
            vmem_limit_bytes=vmem),
    )(xq, xkv, p["w_q"], p["b_q"], p["w_k"], p["b_k"], p["w_v"], p["b_v"],
      p["w_o"], p["b_o"], p["ln_g"], p["ln_b"], kpad, non_pad)


# ----------------------------------------------------------------------------
# Kernel 2: fused position-wise FFN + residual + LayerNorm + non-pad mask
# ----------------------------------------------------------------------------
def _ffn_sublayer_kernel(x_ref, w1_ref, b1_ref, w2_ref, b2_ref,
                         g_ref, b_ref, npad_ref, o_ref):
    x = x_ref[...]                                                # (tm, D) bf16
    h = jnp.dot(x, w1_ref[...], preferred_element_type=jnp.float32) + b1_ref[...]
    h = jnp.maximum(h, 0.0)
    f = jnp.dot(h.astype(_MXU_DTYPE), w2_ref[...],
                preferred_element_type=jnp.float32) + b2_ref[...]
    y = _layer_norm(f + x.astype(jnp.float32), g_ref[...], b_ref[...]) * npad_ref[...]
    o_ref[...] = y.astype(o_ref.dtype)


def ffn_sublayer(x, non_pad, p):
    B, L, D = x.shape
    M = B * L
    Dff = p["w1"].shape[1]
    x2 = x.reshape(M, D)
    np2 = non_pad.reshape(M, 1)
    tm = _pick_sublane_tile(M, 256)
    wbuf = _weight_buffers()

    vmem = _vmem_limit([
        ((tm, D), _MXU_DTYPE, 2), ((tm, 1), jnp.float32, 2),
        ((D, Dff), _MXU_DTYPE, wbuf), ((1, Dff), jnp.float32, wbuf),
        ((Dff, D), _MXU_DTYPE, wbuf), ((1, D), jnp.float32, 3 * wbuf),
        ((tm, D), _MXU_DTYPE, 2),
        ((tm, Dff), jnp.float32, 2), ((tm, D), jnp.float32, 2),   # intermediates
    ])

    out = pl.pallas_call(
        _ffn_sublayer_kernel,
        out_shape=jax.ShapeDtypeStruct((M, D), _MXU_DTYPE),
        grid=(M // tm,),
        in_specs=[
            pl.BlockSpec((tm, D), lambda i: (i, 0)),              # x (residual)
            _const_spec((D, Dff), 1), _const_spec((1, Dff), 1),   # W1, b1
            _const_spec((Dff, D), 1), _const_spec((1, D), 1),     # W2, b2
            _const_spec((1, D), 1), _const_spec((1, D), 1),       # LN gamma, beta
            pl.BlockSpec((tm, 1), lambda i: (i, 0)),              # non-pad mask
        ],
        out_specs=pl.BlockSpec((tm, D), lambda i: (i, 0)),
        compiler_params=pltpu.CompilerParams(
            dimension_semantics=("parallel",), vmem_limit_bytes=vmem),
    )(x2, p["w1"], p["b1"], p["w2"], p["b2"], p["ln_g"], p["ln_b"], np2)
    return out.reshape(B, L, D)


# ----------------------------------------------------------------------------
# Kernel 3: tiled (M, N, K) matmul + bias, f32 VMEM accumulator (vocab projection)
# ----------------------------------------------------------------------------
def _matmul_bias_kernel(x_ref, w_ref, b_ref, o_ref, acc_ref):
    @pl.when(pl.program_id(2) == 0)
    def _():
        acc_ref[...] = jnp.zeros_like(acc_ref)

    acc_ref[...] += jnp.dot(x_ref[...], w_ref[...],
                            preferred_element_type=jnp.float32)

    @pl.when(pl.program_id(2) == pl.num_programs(2) - 1)
    def _():
        o_ref[...] = (acc_ref[...] + b_ref[...]).astype(o_ref.dtype)


def tiled_linear(x2d, w, b2d):
    M, K = x2d.shape
    N = w.shape[1]
    tm = _pick_sublane_tile(M, 512)
    tn = _pick_lane_tile(N, 1024)
    tk = _pick_lane_tile(K, 512)
    vmem = _vmem_limit([
        ((tm, tk), _MXU_DTYPE, 2), ((tk, tn), _MXU_DTYPE, 2),
        ((1, tn), jnp.float32, 2), ((tm, tn), _MXU_DTYPE, 2),
        ((tm, tn), jnp.float32, 1),
    ])
    return pl.pallas_call(
        _matmul_bias_kernel,
        out_shape=jax.ShapeDtypeStruct((M, N), _MXU_DTYPE),       # bf16 logits
        grid=(M // tm, N // tn, K // tk),
        in_specs=[
            pl.BlockSpec((tm, tk), lambda i, j, k: (i, k)),
            pl.BlockSpec((tk, tn), lambda i, j, k: (k, j)),
            pl.BlockSpec((1, tn), lambda i, j, k: (0, j)),
        ],
        out_specs=pl.BlockSpec((tm, tn), lambda i, j, k: (i, j)),
        scratch_shapes=[pltpu.VMEM((tm, tn), jnp.float32)],
        compiler_params=pltpu.CompilerParams(
            dimension_semantics=("parallel", "parallel", "arbitrary"),
            vmem_limit_bytes=vmem),
    )(x2d, w, b2d)


# ----------------------------------------------------------------------------
# Model glue (embeddings, masks, parameter init) — plain JAX
# ----------------------------------------------------------------------------
def get_sinusoid_encoding_table(n_position, d_hid, padding_idx=None):
    pos = np.arange(n_position, dtype=np.float64)[:, None]
    hid = np.arange(d_hid)[None, :]
    angle = pos / np.power(10000.0, 2 * (hid // 2) / d_hid)
    table = np.zeros((n_position, d_hid), dtype=np.float64)
    table[:, 0::2] = np.sin(angle[:, 0::2])
    table[:, 1::2] = np.cos(angle[:, 1::2])
    if padding_idx is not None:
        table[padding_idx] = 0.0
    return jnp.asarray(table, dtype=jnp.float32)


def init_params(key, cfg):
    d_model, d_inner = cfg["d_model"], cfg["d_inner"]
    n_head, d_k, d_v = cfg["num_head"], cfg["d_k"], cfg["d_v"]
    vocab = cfg["vocab_size"]
    vocab_pad = ((vocab + 127) // 128) * 128          # lane-dense logits output
    d_pad = ((max(d_k, d_v) + 127) // 128) * 128      # lane-dense padded head dim

    def dense(k, din, dout):
        return jax.random.normal(k, (din, dout), jnp.float32) * 0.02

    keys = iter(jax.random.split(key, 256))

    last_w = jnp.zeros((d_model, vocab_pad), jnp.float32)
    last_w = last_w.at[:, :vocab].set(dense(next(keys), d_model, vocab))

    params = {
        "emb": jax.random.normal(next(keys), (vocab, cfg["d_word_vec"]),
                                 jnp.float32) * 0.02,
        "pos": get_sinusoid_encoding_table(cfg["len_max_seq"] + 1,
                                           cfg["d_word_vec"], padding_idx=0),
        "last_w": last_w.astype(_MXU_DTYPE),
        "last_b": jnp.zeros((1, vocab_pad), jnp.float32),
        "layers": [],
    }

    def head_major(w, d_h):
        # (D, H*d_h) -> (H, D, d_pad); zero padding on the head dim is an exact
        # no-op through QK^T / PV / the output projection.
        w = w.reshape(d_model, n_head, d_h).transpose(1, 0, 2)
        w = jnp.pad(w, ((0, 0), (0, 0), (0, d_pad - d_h)))
        return w.astype(_MXU_DTYPE)

    def attn_params():
        # NOTE: the 1/sqrt(d_k) softmax scale is folded into W_q (b_q is zero here;
        # with real checkpoints it must be pre-scaled too).
        scale = 1.0 / float(np.sqrt(d_k))
        w_q = dense(next(keys), d_model, n_head * d_k) * scale
        w_k = dense(next(keys), d_model, n_head * d_k)
        w_v = dense(next(keys), d_model, n_head * d_v)
        w_o = dense(next(keys), n_head * d_v, d_model)
        w_o = jnp.pad(w_o.reshape(n_head, d_v, d_model),
                      ((0, 0), (0, d_pad - d_v), (0, 0))).astype(_MXU_DTYPE)
        zb = jnp.zeros((n_head, 1, d_pad), jnp.float32)
        return {
            "w_q": head_major(w_q, d_k), "b_q": zb,
            "w_k": head_major(w_k, d_k), "b_k": zb,
            "w_v": head_major(w_v, d_v), "b_v": zb,
            "w_o": w_o, "b_o": jnp.zeros((1, d_model), jnp.float32),
            "ln_g": jnp.ones((1, d_model), jnp.float32),
            "ln_b": jnp.zeros((1, d_model), jnp.float32),
        }

    for _ in range(cfg["n_layers"]):
        params["layers"].append({
            "slf": attn_params(),
            "enc": attn_params(),
            "ffn": {
                "w1": dense(next(keys), d_model, d_inner).astype(_MXU_DTYPE),
                "b1": jnp.zeros((1, d_inner), jnp.float32),
                "w2": dense(next(keys), d_inner, d_model).astype(_MXU_DTYPE),
                "b2": jnp.zeros((1, d_model), jnp.float32),
                "ln_g": jnp.ones((1, d_model), jnp.float32),
                "ln_b": jnp.zeros((1, d_model), jnp.float32),
            },
        })
    return params


def bert_decoder_forward(params, tgt_seq, src_seq, enc_output, cfg):
    B, Lt = tgt_seq.shape

    # masks (PAD id == 0); key-pad masks stay (B, 1, Lk) — heads / rows reuse them
    non_pad = (tgt_seq != 0).astype(jnp.float32)[..., None]       # (B, Lt, 1)
    tgt_kpad = (tgt_seq == 0).astype(jnp.float32)[:, None, :]     # (B, 1, Lt)
    src_kpad = (src_seq == 0).astype(jnp.float32)[:, None, :]     # (B, 1, Ls)

    # word embedding + sinusoidal positional encoding (positions 1..Lt, as in ref);
    # activations carried in bf16 between kernels (f32 LN / softmax in-kernel).
    tgt_pos = jnp.broadcast_to(jnp.arange(1, Lt + 1)[None, :], (B, Lt))
    x = (params["emb"][tgt_seq] + params["pos"][tgt_pos]).astype(_MXU_DTYPE)
    enc = enc_output.astype(_MXU_DTYPE)

    for lp in params["layers"]:
        x = attn_sublayer(x, x, tgt_kpad, non_pad, lp["slf"], causal=True)
        x = attn_sublayer(x, enc, src_kpad, non_pad, lp["enc"], causal=False)
        x = ffn_sublayer(x, non_pad, lp["ffn"])

    logits = tiled_linear(x.reshape(B * Lt, -1), params["last_w"], params["last_b"])
    return logits[:, :cfg["vocab_size"]].reshape(B, Lt, cfg["vocab_size"])


# ----------------------------------------------------------------------------
if __name__ == "__main__":
    cfg = dict(
        len_max_seq=8,
        d_word_vec=32,
        n_layers=2,
        num_head=2,
        d_k=16,
        d_v=16,
        d_model=32,
        d_inner=64,
        vocab_size=50,
    )
    B, Lt, Ls = 2, 8, 8

    key = jax.random.PRNGKey(0)
    k_tgt, k_src, k_enc, k_par = jax.random.split(key, 4)

    tgt_seq = jax.random.randint(k_tgt, (B, Lt), 1, cfg["vocab_size"], dtype=jnp.int32)
    tgt_seq = tgt_seq.at[:, -1].set(0)      # trailing PAD tokens exercise the masks
    src_seq = jax.random.randint(k_src, (B, Ls), 1, cfg["vocab_size"], dtype=jnp.int32)
    src_seq = src_seq.at[:, -2:].set(0)
    enc_output = jax.random.normal(k_enc, (B, Ls, cfg["d_model"]), jnp.float32)

    params = init_params(k_par, cfg)

    fwd = jax.jit(functools.partial(bert_decoder_forward, cfg=cfg))
    out = fwd(params, tgt_seq, src_seq, enc_output)
    out = jax.block_until_ready(out)
    assert out.shape == (B, Lt, cfg["vocab_size"])
    assert bool(jnp.all(jnp.isfinite(out.astype(jnp.float32))))
    print("KERNEL_OK")
</pallas_src>

<mosaic_0001>
module attributes {stable_mosaic.version = 11 : i64} {
  func.func @k(%arg0: i32, %arg1: memref<8x128xf32, #tpu.memory_space<vmem>>, %arg2: memref<8x128xf32, #tpu.memory_space<vmem>>, %arg3: memref<8x128xf32, #tpu.memory_space<vmem>>) attributes {dimension_semantics = [#tpu.dimension_semantics<arbitrary>], iteration_bounds = array<i64: 2>, scalar_prefetch = 0 : i64, scratch_operands = 0 : i64, tpu.core_type = #tpu.core_type<tc>, window_params = [{pipeline_mode = #tpu.pipeline_mode<synchronous>, transform_indices = @transform_0, window_bounds = array<i64: 8, 128>}, {transform_indices = @transform_1, window_bounds = array<i64: 8, 128>}, {transform_indices = @transform_2, window_bounds = array<i64: 8, 128>}]} {
    %c0 = arith.constant 0 : index
    %c0_0 = arith.constant 0 : index
    %0 = vector.load %arg2[%c0, %c0_0] : memref<8x128xf32, #tpu.memory_space<vmem>>, vector<8x128xf32>
    %c0_1 = arith.constant 0 : index
    %c0_2 = arith.constant 0 : index
    %1 = vector.load %arg1[%c0_1, %c0_2] : memref<8x128xf32, #tpu.memory_space<vmem>>, vector<8x128xf32>
    %2 = arith.addf %0, %1 : vector<8x128xf32>
    %c0_3 = arith.constant 0 : index
    %c0_4 = arith.constant 0 : index
    %3 = vector.load %arg3[%c0_3, %c0_4] : memref<8x128xf32, #tpu.memory_space<vmem>>, vector<8x128xf32>
    tpu.vector_store %arg3[%c0_3, %c0_4], %2 {strides = array<i32>} : memref<8x128xf32, #tpu.memory_space<vmem>>, vector<8x128xf32>,
    return
  }
  func.func @transform_0(%arg0: i32) -> (i32, i32) {
    %c0_i32 = arith.constant 0 : i32
    %c0_i32_0 = arith.constant 0 : i32
    %c0_i32_1 = arith.constant 0 : i32
    return %c0_i32, %c0_i32_0 : i32, i32
  }
  func.func @transform_1(%arg0: i32) -> (i32, i32) {
    %c0_i32 = arith.constant 0 : i32
    %c0_i32_0 = arith.constant 0 : i32
    return %arg0, %c0_i32 : i32, i32
  }
  func.func @transform_2(%arg0: i32) -> (i32, i32) {
    %c0_i32 = arith.constant 0 : i32
    %c0_i32_0 = arith.constant 0 : i32
    return %arg0, %c0_i32 : i32, i32
  }
}

module attributes {stable_mosaic.version = 11 : i64} {
  func.func @_attn_sublayer_kernel(%arg0: i32, %arg1: i32, %arg2: memref<1x8x32xbf16, #tpu.memory_space<vmem>>, %arg3: memref<1x8x32xbf16, #tpu.memory_space<vmem>>, %arg4: memref<2x32x128xbf16, #tpu.memory_space<vmem>>, %arg5: memref<2x1x128xf32, #tpu.memory_space<vmem>>, %arg6: memref<2x32x128xbf16, #tpu.memory_space<vmem>>, %arg7: memref<2x1x128xf32, #tpu.memory_space<vmem>>, %arg8: memref<2x32x128xbf16, #tpu.memory_space<vmem>>, %arg9: memref<2x1x128xf32, #tpu.memory_space<vmem>>, %arg10: memref<2x128x32xbf16, #tpu.memory_space<vmem>>, %arg11: memref<1x32xf32, #tpu.memory_space<vmem>>, %arg12: memref<1x32xf32, #tpu.memory_space<vmem>>, %arg13: memref<1x32xf32, #tpu.memory_space<vmem>>, %arg14: memref<1x1x8xf32, #tpu.memory_space<vmem>>, %arg15: memref<1x8x1xf32, #tpu.memory_space<vmem>>, %arg16: memref<1x8x32xbf16, #tpu.memory_space<vmem>>) attributes {dimension_semantics = [#tpu.dimension_semantics<parallel>, #tpu.dimension_semantics<parallel>], iteration_bounds = array<i64: 2, 1>, scalar_prefetch = 0 : i64, scratch_operands = 0 : i64, tpu.core_type = #tpu.core_type<tc>, window_params = [{transform_indices = @transform_0, window_bounds = array<i64: 1, 8, 32>}, {transform_indices = @transform_1, window_bounds = array<i64: 1, 8, 32>}, {pipeline_mode = #tpu.pipeline_mode<synchronous>, transform_indices = @transform_2, window_bounds = array<i64: 2, 32, 128>}, {pipeline_mode = #tpu.pipeline_mode<synchronous>, transform_indices = @transform_3, window_bounds = array<i64: 2, 1, 128>}, {pipeline_mode = #tpu.pipeline_mode<synchronous>, transform_indices = @transform_4, window_bounds = array<i64: 2, 32, 128>}, {pipeline_mode = #tpu.pipeline_mode<synchronous>, transform_indices = @transform_5, window_bounds = array<i64: 2, 1, 128>}, {pipeline_mode = #tpu.pipeline_mode<synchronous>, transform_indices = @transform_6, window_bounds = array<i64: 2, 32, 128>}, {pipeline_mode = #tpu.pipeline_mode<synchronous>, transform_indices = @transform_7, window_bounds = array<i64: 2, 1, 128>}, {pipeline_mode = #tpu.pipeline_mode<synchronous>, transform_indices = @transform_8, window_bounds = array<i64: 2, 128, 32>}, {pipeline_mode = #tpu.pipeline_mode<synchronous>, transform_indices = @transform_9, window_bounds = array<i64: 1, 32>}, {pipeline_mode = #tpu.pipeline_mode<synchronous>, transform_indices = @transform_10, window_bounds = array<i64: 1, 32>}, {pipeline_mode = #tpu.pipeline_mode<synchronous>, transform_indices = @transform_11, window_bounds = array<i64: 1, 32>}, {transform_indices = @transform_12, window_bounds = array<i64: 1, 1, 8>}, {transform_indices = @transform_13, window_bounds = array<i64: 1, 8, 1>}, {transform_indices = @transform_14, window_bounds = array<i64: 1, 8, 32>}]} {
    %c0 = arith.constant 0 : index
    %c0_0 = arith.constant 0 : index
    %c0_1 = arith.constant 0 : index
    %0 = vector.load %arg2[%c0, %c0_0, %c0_1] : memref<1x8x32xbf16, #tpu.memory_space<vmem>>, vector<1x8x32xbf16>
    %1 = vector.shape_cast %0 : vector<1x8x32xbf16> to vector<8x32xbf16>
    %c0_2 = arith.constant 0 : index
    %c0_3 = arith.constant 0 : index
    %c0_4 = arith.constant 0 : index
    %2 = vector.load %arg3[%c0_2, %c0_3, %c0_4] : memref<1x8x32xbf16, #tpu.memory_space<vmem>>, vector<1x8x32xbf16>
    %3 = vector.shape_cast %2 : vector<1x8x32xbf16> to vector<8x32xbf16>
    %4 = vector.shape_cast %1 : vector<8x32xbf16> to vector<1x8x32xbf16>
    %5 = vector.shape_cast %4 : vector<1x8x32xbf16> to vector<1x8x32xbf16>
    %6 = vector.broadcast %5 : vector<1x8x32xbf16> to vector<2x8x32xbf16>
    %7 = vector.shape_cast %3 : vector<8x32xbf16> to vector<1x8x32xbf16>
    %8 = vector.shape_cast %7 : vector<1x8x32xbf16> to vector<1x8x32xbf16>
    %9 = vector.broadcast %8 : vector<1x8x32xbf16> to vector<2x8x32xbf16>
    %c0_5 = arith.constant 0 : index
    %c0_6 = arith.constant 0 : index
    %c0_7 = arith.constant 0 : index
    %10 = vector.load %arg4[%c0_5, %c0_6, %c0_7] : memref<2x32x128xbf16, #tpu.memory_space<vmem>>, vector<2x32x128xbf16>
    %cst = arith.constant dense<0.000000e+00> : vector<2x8x128xf32>
    %11 = tpu.matmul %6, %10, %cst {dimension_numbers = #tpu.dot_dimension_numbers<[2], [1], [1], [2], [0, 0, 0, 1, 1, 2], [0], [0]>} : vector<2x8x32xbf16>, vector<2x32x128xbf16>, vector<2x8x128xf32> -> vector<2x8x128xf32>
    %c0_8 = arith.constant 0 : index
    %c0_9 = arith.constant 0 : index
    %c0_10 = arith.constant 0 : index
    %12 = vector.load %arg5[%c0_8, %c0_9, %c0_10] : memref<2x1x128xf32, #tpu.memory_space<vmem>>, vector<2x1x128xf32>
    %13 = vector.broadcast %12 : vector<2x1x128xf32> to vector<2x8x128xf32>
    %14 = arith.addf %11, %13 : vector<2x8x128xf32>
    %c0_11 = arith.constant 0 : index
    %c0_12 = arith.constant 0 : index
    %c0_13 = arith.constant 0 : index
    %15 = vector.load %arg6[%c0_11, %c0_12, %c0_13] : memref<2x32x128xbf16, #tpu.memory_space<vmem>>, vector<2x32x128xbf16>
    %cst_14 = arith.constant dense<0.000000e+00> : vector<2x8x128xf32>
    %16 = tpu.matmul %9, %15, %cst_14 {dimension_numbers = #tpu.dot_dimension_numbers<[2], [1], [1], [2], [0, 0, 0, 1, 1, 2], [0], [0]>} : vector<2x8x32xbf16>, vector<2x32x128xbf16>, vector<2x8x128xf32> -> vector<2x8x128xf32>
    %c0_15 = arith.constant 0 : index
    %c0_16 = arith.constant 0 : index
    %c0_17 = arith.constant 0 : index
    %17 = vector.load %arg7[%c0_15, %c0_16, %c0_17] : memref<2x1x128xf32, #tpu.memory_space<vmem>>, vector<2x1x128xf32>
    %18 = vector.broadcast %17 : vector<2x1x128xf32> to vector<2x8x128xf32>
    %19 = arith.addf %16, %18 : vector<2x8x128xf32>
    %c0_18 = arith.constant 0 : index
    %c0_19 = arith.constant 0 : index
    %c0_20 = arith.constant 0 : index
    %20 = vector.load %arg8[%c0_18, %c0_19, %c0_20] : memref<2x32x128xbf16, #tpu.memory_space<vmem>>, vector<2x32x128xbf16>
    %cst_21 = arith.constant dense<0.000000e+00> : vector<2x8x128xf32>
    %21 = tpu.matmul %9, %20, %cst_21 {dimension_numbers = #tpu.dot_dimension_numbers<[2], [1], [1], [2], [0, 0, 0, 1, 1, 2], [0], [0]>} : vector<2x8x32xbf16>, vector<2x32x128xbf16>, vector<2x8x128xf32> -> vector<2x8x128xf32>
    %c0_22 = arith.constant 0 : index
    %c0_23 = arith.constant 0 : index
    %c0_24 = arith.constant 0 : index
    %22 = vector.load %arg9[%c0_22, %c0_23, %c0_24] : memref<2x1x128xf32, #tpu.memory_space<vmem>>, vector<2x1x128xf32>
    %23 = vector.broadcast %22 : vector<2x1x128xf32> to vector<2x8x128xf32>
    %24 = arith.addf %21, %23 : vector<2x8x128xf32>
    %c0_25 = arith.constant 0 : index
    %c0_26 = arith.constant 0 : index
    %c0_27 = arith.constant 0 : index
    %25 = vector.load %arg14[%c0_25, %c0_26, %c0_27] : memref<1x1x8xf32, #tpu.memory_space<vmem>>, vector<1x1x8xf32>
    %26 = vector.shape_cast %25 : vector<1x1x8xf32> to vector<1x8xf32>
    %cst_28 = arith.constant 5.000000e-01 : f32
    %27 = vector.broadcast %cst_28 : f32 to vector<1x8xf32>
    %28 = arith.cmpf ogt, %26, %27 : vector<1x8xf32>
    %cst_29 = arith.constant -1.000000e+30 : f32
    %cst_30 = arith.constant 0.000000e+00 : f32
    %29 = vector.broadcast %cst_29 : f32 to vector<1x8xf32>
    %30 = vector.broadcast %cst_30 : f32 to vector<1x8xf32>
    %31 = arith.select %28, %29, %30 : vector<1x8xi1>, vector<1x8xf32>
    %32 = vector.shape_cast %31 : vector<1x8xf32> to vector<1x8xf32>
    %33 = vector.broadcast %32 : vector<1x8xf32> to vector<8x8xf32>
    %34 = arith.truncf %14 : vector<2x8x128xf32> to vector<2x8x128xbf16>
    %35 = arith.truncf %19 : vector<2x8x128xf32> to vector<2x8x128xbf16>
    %cst_31 = arith.constant dense<0.000000e+00> : vector<2x8x8xf32>
    %36 = tpu.matmul %34, %35, %cst_31 {dimension_numbers = #tpu.dot_dimension_numbers<[2], [2], [1], [1], [0, 0, 0, 1, 1, 1], [0], [0]>} : vector<2x8x128xbf16>, vector<2x8x128xbf16>, vector<2x8x8xf32> -> vector<2x8x8xf32>
    %37 = vector.shape_cast %33 : vector<8x8xf32> to vector<1x8x8xf32>
    %38 = vector.broadcast %37 : vector<1x8x8xf32> to vector<2x8x8xf32>
    %39 = arith.addf %36, %38 : vector<2x8x8xf32>
    %cst_32 = arith.constant dense<0xFF800000> : vector<2x8xf32>
    %40 = vector.multi_reduction <maximumf>, %39, %cst_32 [2] : vector<2x8x8xf32> to vector<2x8xf32>
    %41 = vector.shape_cast %40 : vector<2x8xf32> to vector<2x8x1xf32>
    %42 = vector.broadcast %41 : vector<2x8x1xf32> to vector<2x8x8xf32>
    %43 = arith.subf %39, %42 : vector<2x8x8xf32>
    %44 = math.exp %43 : vector<2x8x8xf32>
    %cst_33 = arith.constant dense<0.000000e+00> : vector<2x8xf32>
    %45 = vector.multi_reduction <add>, %44, %cst_33 [2] : vector<2x8x8xf32> to vector<2x8xf32>
    %46 = vector.shape_cast %45 : vector<2x8xf32> to vector<2x8x1xf32>
    %47 = tpu.reciprocal %46 {approx = true} : vector<2x8x1xf32> -> vector<2x8x1xf32>
    %48 = vector.broadcast %47 : vector<2x8x1xf32> to vector<2x8x8xf32>
    %49 = arith.mulf %44, %48 : vector<2x8x8xf32>
    %50 = arith.truncf %49 : vector<2x8x8xf32> to vector<2x8x8xbf16>
    %51 = arith.truncf %24 : vector<2x8x128xf32> to vector<2x8x128xbf16>
    %cst_34 = arith.constant dense<0.000000e+00> : vector<2x8x128xf32>
    %52 = tpu.matmul %50, %51, %cst_34 {dimension_numbers = #tpu.dot_dimension_numbers<[2], [1], [1], [2], [0, 0, 0, 1, 1, 2], [0], [0]>} : vector<2x8x8xbf16>, vector<2x8x128xbf16>, vector<2x8x128xf32> -> vector<2x8x128xf32>
    %53 = arith.truncf %52 : vector<2x8x128xf32> to vector<2x8x128xbf16>
    %c0_35 = arith.constant 0 : index
    %c0_36 = arith.constant 0 : index
    %c0_37 = arith.constant 0 : index
    %54 = vector.load %arg10[%c0_35, %c0_36, %c0_37] : memref<2x128x32xbf16, #tpu.memory_space<vmem>>, vector<2x128x32xbf16>
    %cst_38 = arith.constant dense<0.000000e+00> : vector<2x8x32xf32>
    %55 = tpu.matmul %53, %54, %cst_38 {dimension_numbers = #tpu.dot_dimension_numbers<[2], [1], [1], [2], [0, 0, 0, 1, 1, 2], [0], [0]>} : vector<2x8x128xbf16>, vector<2x128x32xbf16>, vector<2x8x32xf32> -> vector<2x8x32xf32>
    %cst_39 = arith.constant dense<0.000000e+00> : vector<8x32xf32>
    %56 = vector.multi_reduction <add>, %55, %cst_39 [0] : vector<2x8x32xf32> to vector<8x32xf32>
    %c0_40 = arith.constant 0 : index
    %c0_41 = arith.constant 0 : index
    %57 = vector.load %arg11[%c0_40, %c0_41] : memref<1x32xf32, #tpu.memory_space<vmem>>, vector<1x32xf32>
    %58 = vector.broadcast %57 : vector<1x32xf32> to vector<8x32xf32>
    %59 = arith.addf %56, %58 : vector<8x32xf32>
    %60 = arith.extf %1 : vector<8x32xbf16> to vector<8x32xf32>
    %61 = arith.addf %59, %60 : vector<8x32xf32>
    %c0_42 = arith.constant 0 : index
    %c0_43 = arith.constant 0 : index
    %62 = vector.load %arg12[%c0_42, %c0_43] : memref<1x32xf32, #tpu.memory_space<vmem>>, vector<1x32xf32>
    %c0_44 = arith.constant 0 : index
    %c0_45 = arith.constant 0 : index
    %63 = vector.load %arg13[%c0_44, %c0_45] : memref<1x32xf32, #tpu.memory_space<vmem>>, vector<1x32xf32>
    %cst_46 = arith.constant dense<0.000000e+00> : vector<8xf32>
    %64 = vector.multi_reduction <add>, %61, %cst_46 [1] : vector<8x32xf32> to vector<8xf32>
    %65 = vector.shape_cast %64 : vector<8xf32> to vector<8x1xf32>
    %cst_47 = arith.constant 3.200000e+01 : f32
    %66 = vector.broadcast %cst_47 : f32 to vector<8x1xf32>
    %67 = arith.divf %65, %66 : vector<8x1xf32>
    %68 = vector.broadcast %67 : vector<8x1xf32> to vector<8x32xf32>
    %69 = arith.subf %61, %68 : vector<8x32xf32>
    %70 = arith.mulf %69, %69 : vector<8x32xf32>
    %cst_48 = arith.constant dense<0.000000e+00> : vector<8xf32>
    %71 = vector.multi_reduction <add>, %70, %cst_48 [1] : vector<8x32xf32> to vector<8xf32>
    %72 = vector.shape_cast %71 : vector<8xf32> to vector<8x1xf32>
    %cst_49 = arith.constant 3.200000e+01 : f32
    %73 = vector.broadcast %cst_49 : f32 to vector<8x1xf32>
    %74 = arith.divf %72, %73 : vector<8x1xf32>
    %75 = vector.broadcast %67 : vector<8x1xf32> to vector<8x32xf32>
    %76 = arith.subf %61, %75 : vector<8x32xf32>
    %cst_50 = arith.constant 9.99999974E-6 : f32
    %77 = vector.broadcast %cst_50 : f32 to vector<8x1xf32>
    %78 = arith.addf %74, %77 : vector<8x1xf32>
    %79 = math.rsqrt %78 : vector<8x1xf32>
    %80 = vector.broadcast %79 : vector<8x1xf32> to vector<8x32xf32>
    %81 = arith.mulf %76, %80 : vector<8x32xf32>
    %82 = vector.broadcast %62 : vector<1x32xf32> to vector<8x32xf32>
    %83 = arith.mulf %81, %82 : vector<8x32xf32>
    %84 = vector.broadcast %63 : vector<1x32xf32> to vector<8x32xf32>
    %85 = arith.addf %83, %84 : vector<8x32xf32>
    %c0_51 = arith.constant 0 : index
    %c0_52 = arith.constant 0 : index
    %c0_53 = arith.constant 0 : index
    %86 = vector.load %arg15[%c0_51, %c0_52, %c0_53] : memref<1x8x1xf32, #tpu.memory_space<vmem>>, vector<1x8x1xf32>
    %87 = vector.shape_cast %86 : vector<1x8x1xf32> to vector<8x1xf32>
    %88 = vector.broadcast %87 : vector<8x1xf32> to vector<8x32xf32>
    %89 = arith.mulf %85, %88 : vector<8x32xf32>
    %90 = arith.truncf %89 : vector<8x32xf32> to vector<8x32xbf16>
    %c0_54 = arith.constant 0 : index
    %c0_55 = arith.constant 0 : index
    %c0_56 = arith.constant 0 : index
    %91 = vector.load %arg16[%c0_54, %c0_55, %c0_56] : memref<1x8x32xbf16, #tpu.memory_space<vmem>>, vector<1x8x32xbf16>
    %92 = vector.shape_cast %91 : vector<1x8x32xbf16> to vector<8x32xbf16>
    %93 = vector.shape_cast %90 : vector<8x32xbf16> to vector<1x8x32xbf16>
    tpu.vector_store %arg16[%c0_54, %c0_55, %c0_56], %93 {strides = array<i32>} : memref<1x8x32xbf16, #tpu.memory_space<vmem>>, vector<1x8x32xbf16>,
    return
  }
  func.func @transform_0(%arg0: i32, %arg1: i32) -> (i32, i32, i32) {
    %c0_i32 = arith.constant 0 : i32
    %c0_i32_0 = arith.constant 0 : i32
    return %arg0, %arg1, %c0_i32 : i32, i32, i32
  }
  func.func @transform_1(%arg0: i32, %arg1: i32) -> (i32, i32, i32) {
    %c0_i32 = arith.constant 0 : i32
    %c0_i32_0 = arith.constant 0 : i32
    %c0_i32_1 = arith.constant 0 : i32
    return %arg0, %c0_i32, %c0_i32_0 : i32, i32, i32
  }
  func.func @transform_2(%arg0: i32, %arg1: i32) -> (i32, i32, i32) {
    %c0_i32 = arith.constant 0 : i32
    %c0_i32_0 = arith.constant 0 : i32
    %c0_i32_1 = arith.constant 0 : i32
    %c0_i32_2 = arith.constant 0 : i32
    return %c0_i32, %c0_i32_0, %c0_i32_1 : i32, i32, i32
  }
  func.func @transform_3(%arg0: i32, %arg1: i32) -> (i32, i32, i32) {
    %c0_i32 = arith.constant 0 : i32
    %c0_i32_0 = arith.constant 0 : i32
    %c0_i32_1 = arith.constant 0 : i32
    %c0_i32_2 = arith.constant 0 : i32
    return %c0_i32, %c0_i32_0, %c0_i32_1 : i32, i32, i32
  }
  func.func @transform_4(%arg0: i32, %arg1: i32) -> (i32, i32, i32) {
    %c0_i32 = arith.constant 0 : i32
    %c0_i32_0 = arith.constant 0 : i32
    %c0_i32_1 = arith.constant 0 : i32
    %c0_i32_2 = arith.constant 0 : i32
    return %c0_i32, %c0_i32_0, %c0_i32_1 : i32, i32, i32
  }
  func.func @transform_5(%arg0: i32, %arg1: i32) -> (i32, i32, i32) {
    %c0_i32 = arith.constant 0 : i32
    %c0_i32_0 = arith.constant 0 : i32
    %c0_i32_1 = arith.constant 0 : i32
    %c0_i32_2 = arith.constant 0 : i32
    return %c0_i32, %c0_i32_0, %c0_i32_1 : i32, i32, i32
  }
  func.func @transform_6(%arg0: i32, %arg1: i32) -> (i32, i32, i32) {
    %c0_i32 = arith.constant 0 : i32
    %c0_i32_0 = arith.constant 0 : i32
    %c0_i32_1 = arith.constant 0 : i32
    %c0_i32_2 = arith.constant 0 : i32
    return %c0_i32, %c0_i32_0, %c0_i32_1 : i32, i32, i32
  }
  func.func @transform_7(%arg0: i32, %arg1: i32) -> (i32, i32, i32) {
    %c0_i32 = arith.constant 0 : i32
    %c0_i32_0 = arith.constant 0 : i32
    %c0_i32_1 = arith.constant 0 : i32
    %c0_i32_2 = arith.constant 0 : i32
    return %c0_i32, %c0_i32_0, %c0_i32_1 : i32, i32, i32
  }
  func.func @transform_8(%arg0: i32, %arg1: i32) -> (i32, i32, i32) {
    %c0_i32 = arith.constant 0 : i32
    %c0_i32_0 = arith.constant 0 : i32
    %c0_i32_1 = arith.constant 0 : i32
    %c0_i32_2 = arith.constant 0 : i32
    return %c0_i32, %c0_i32_0, %c0_i32_1 : i32, i32, i32
  }
  func.func @transform_9(%arg0: i32, %arg1: i32) -> (i32, i32) {
    %c0_i32 = arith.constant 0 : i32
    %c0_i32_0 = arith.constant 0 : i32
    %c0_i32_1 = arith.constant 0 : i32
    return %c0_i32, %c0_i32_0 : i32, i32
  }
  func.func @transform_10(%arg0: i32, %arg1: i32) -> (i32, i32) {
    %c0_i32 = arith.constant 0 : i32
    %c0_i32_0 = arith.constant 0 : i32
    %c0_i32_1 = arith.constant 0 : i32
    return %c0_i32, %c0_i32_0 : i32, i32
  }
  func.func @transform_11(%arg0: i32, %arg1: i32) -> (i32, i32) {
    %c0_i32 = arith.constant 0 : i32
    %c0_i32_0 = arith.constant 0 : i32
    %c0_i32_1 = arith.constant 0 : i32
    return %c0_i32, %c0_i32_0 : i32, i32
  }
  func.func @transform_12(%arg0: i32, %arg1: i32) -> (i32, i32, i32) {
    %c0_i32 = arith.constant 0 : i32
    %c0_i32_0 = arith.constant 0 : i32
    %c0_i32_1 = arith.constant 0 : i32
    return %arg0, %c0_i32, %c0_i32_0 : i32, i32, i32
  }
  func.func @transform_13(%arg0: i32, %arg1: i32) -> (i32, i32, i32) {
    %c0_i32 = arith.constant 0 : i32
    %c0_i32_0 = arith.constant 0 : i32
    return %arg0, %arg1, %c0_i32 : i32, i32, i32
  }
  func.func @transform_14(%arg0: i32, %arg1: i32) -> (i32, i32, i32) {
    %c0_i32 = arith.constant 0 : i32
    %c0_i32_0 = arith.constant 0 : i32
    return %arg0, %arg1, %c0_i32 : i32, i32, i32
  }
}

module attributes {stable_mosaic.version = 11 : i64} {
  func.func @_attn_sublayer_kernel(%arg0: i32, %arg1: i32, %arg2: memref<1x8x32xbf16, #tpu.memory_space<vmem>>, %arg3: memref<1x8x32xbf16, #tpu.memory_space<vmem>>, %arg4: memref<2x32x128xbf16, #tpu.memory_space<vmem>>, %arg5: memref<2x1x128xf32, #tpu.memory_space<vmem>>, %arg6: memref<2x32x128xbf16, #tpu.memory_space<vmem>>, %arg7: memref<2x1x128xf32, #tpu.memory_space<vmem>>, %arg8: memref<2x32x128xbf16, #tpu.memory_space<vmem>>, %arg9: memref<2x1x128xf32, #tpu.memory_space<vmem>>, %arg10: memref<2x128x32xbf16, #tpu.memory_space<vmem>>, %arg11: memref<1x32xf32, #tpu.memory_space<vmem>>, %arg12: memref<1x32xf32, #tpu.memory_space<vmem>>, %arg13: memref<1x32xf32, #tpu.memory_space<vmem>>, %arg14: memref<1x1x8xf32, #tpu.memory_space<vmem>>, %arg15: memref<1x8x1xf32, #tpu.memory_space<vmem>>, %arg16: memref<1x8x32xbf16, #tpu.memory_space<vmem>>) attributes {dimension_semantics = [#tpu.dimension_semantics<parallel>, #tpu.dimension_semantics<parallel>], iteration_bounds = array<i64: 2, 1>, scalar_prefetch = 0 : i64, scratch_operands = 0 : i64, tpu.core_type = #tpu.core_type<tc>, window_params = [{transform_indices = @transform_0, window_bounds = array<i64: 1, 8, 32>}, {transform_indices = @transform_1, window_bounds = array<i64: 1, 8, 32>}, {pipeline_mode = #tpu.pipeline_mode<synchronous>, transform_indices = @transform_2, window_bounds = array<i64: 2, 32, 128>}, {pipeline_mode = #tpu.pipeline_mode<synchronous>, transform_indices = @transform_3, window_bounds = array<i64: 2, 1, 128>}, {pipeline_mode = #tpu.pipeline_mode<synchronous>, transform_indices = @transform_4, window_bounds = array<i64: 2, 32, 128>}, {pipeline_mode = #tpu.pipeline_mode<synchronous>, transform_indices = @transform_5, window_bounds = array<i64: 2, 1, 128>}, {pipeline_mode = #tpu.pipeline_mode<synchronous>, transform_indices = @transform_6, window_bounds = array<i64: 2, 32, 128>}, {pipeline_mode = #tpu.pipeline_mode<synchronous>, transform_indices = @transform_7, window_bounds = array<i64: 2, 1, 128>}, {pipeline_mode = #tpu.pipeline_mode<synchronous>, transform_indices = @transform_8, window_bounds = array<i64: 2, 128, 32>}, {pipeline_mode = #tpu.pipeline_mode<synchronous>, transform_indices = @transform_9, window_bounds = array<i64: 1, 32>}, {pipeline_mode = #tpu.pipeline_mode<synchronous>, transform_indices = @transform_10, window_bounds = array<i64: 1, 32>}, {pipeline_mode = #tpu.pipeline_mode<synchronous>, transform_indices = @transform_11, window_bounds = array<i64: 1, 32>}, {transform_indices = @transform_12, window_bounds = array<i64: 1, 1, 8>}, {transform_indices = @transform_13, window_bounds = array<i64: 1, 8, 1>}, {transform_indices = @transform_14, window_bounds = array<i64: 1, 8, 32>}]} {
    %c0 = arith.constant 0 : index
    %c0_0 = arith.constant 0 : index
    %c0_1 = arith.constant 0 : index
    %0 = vector.load %arg2[%c0, %c0_0, %c0_1] : memref<1x8x32xbf16, #tpu.memory_space<vmem>>, vector<1x8x32xbf16>
    %1 = vector.shape_cast %0 : vector<1x8x32xbf16> to vector<8x32xbf16>
    %c0_2 = arith.constant 0 : index
    %c0_3 = arith.constant 0 : index
    %c0_4 = arith.constant 0 : index
    %2 = vector.load %arg3[%c0_2, %c0_3, %c0_4] : memref<1x8x32xbf16, #tpu.memory_space<vmem>>, vector<1x8x32xbf16>
    %3 = vector.shape_cast %2 : vector<1x8x32xbf16> to vector<8x32xbf16>
    %4 = vector.shape_cast %1 : vector<8x32xbf16> to vector<1x8x32xbf16>
    %5 = vector.shape_cast %4 : vector<1x8x32xbf16> to vector<1x8x32xbf16>
    %6 = vector.broadcast %5 : vector<1x8x32xbf16> to vector<2x8x32xbf16>
    %7 = vector.shape_cast %3 : vector<8x32xbf16> to vector<1x8x32xbf16>
    %8 = vector.shape_cast %7 : vector<1x8x32xbf16> to vector<1x8x32xbf16>
    %9 = vector.broadcast %8 : vector<1x8x32xbf16> to vector<2x8x32xbf16>
    %c0_5 = arith.constant 0 : index
    %c0_6 = arith.constant 0 : index
    %c0_7 = arith.constant 0 : index
    %10 = vector.load %arg4[%c0_5, %c0_6, %c0_7] : memref<2x32x128xbf16, #tpu.memory_space<vmem>>, vector<2x32x128xbf16>
    %cst = arith.constant dense<0.000000e+00> : vector<2x8x128xf32>
    %11 = tpu.matmul %6, %10, %cst {dimension_numbers = #tpu.dot_dimension_numbers<[2], [1], [1], [2], [0, 0, 0, 1, 1, 2], [0], [0]>} : vector<2x8x32xbf16>, vector<2x32x128xbf16>, vector<2x8x128xf32> -> vector<2x8x128xf32>
    %c0_8 = arith.constant 0 : index
    %c0_9 = arith.constant 0 : index
    %c0_10 = arith.constant 0 : index
    %12 = vector.load %arg5[%c0_8, %c0_9, %c0_10] : memref<2x1x128xf32, #tpu.memory_space<vmem>>, vector<2x1x128xf32>
    %13 = vector.broadcast %12 : vector<2x1x128xf32> to vector<2x8x128xf32>
    %14 = arith.addf %11, %13 : vector<2x8x128xf32>
    %c0_11 = arith.constant 0 : index
    %c0_12 = arith.constant 0 : index
    %c0_13 = arith.constant 0 : index
    %15 = vector.load %arg6[%c0_11, %c0_12, %c0_13] : memref<2x32x128xbf16, #tpu.memory_space<vmem>>, vector<2x32x128xbf16>
    %cst_14 = arith.constant dense<0.000000e+00> : vector<2x8x128xf32>
    %16 = tpu.matmul %9, %15, %cst_14 {dimension_numbers = #tpu.dot_dimension_numbers<[2], [1], [1], [2], [0, 0, 0, 1, 1, 2], [0], [0]>} : vector<2x8x32xbf16>, vector<2x32x128xbf16>, vector<2x8x128xf32> -> vector<2x8x128xf32>
    %c0_15 = arith.constant 0 : index
    %c0_16 = arith.constant 0 : index
    %c0_17 = arith.constant 0 : index
    %17 = vector.load %arg7[%c0_15, %c0_16, %c0_17] : memref<2x1x128xf32, #tpu.memory_space<vmem>>, vector<2x1x128xf32>
    %18 = vector.broadcast %17 : vector<2x1x128xf32> to vector<2x8x128xf32>
    %19 = arith.addf %16, %18 : vector<2x8x128xf32>
    %c0_18 = arith.constant 0 : index
    %c0_19 = arith.constant 0 : index
    %c0_20 = arith.constant 0 : index
    %20 = vector.load %arg8[%c0_18, %c0_19, %c0_20] : memref<2x32x128xbf16, #tpu.memory_space<vmem>>, vector<2x32x128xbf16>
    %cst_21 = arith.constant dense<0.000000e+00> : vector<2x8x128xf32>
    %21 = tpu.matmul %9, %20, %cst_21 {dimension_numbers = #tpu.dot_dimension_numbers<[2], [1], [1], [2], [0, 0, 0, 1, 1, 2], [0], [0]>} : vector<2x8x32xbf16>, vector<2x32x128xbf16>, vector<2x8x128xf32> -> vector<2x8x128xf32>
    %c0_22 = arith.constant 0 : index
    %c0_23 = arith.constant 0 : index
    %c0_24 = arith.constant 0 : index
    %22 = vector.load %arg9[%c0_22, %c0_23, %c0_24] : memref<2x1x128xf32, #tpu.memory_space<vmem>>, vector<2x1x128xf32>
    %23 = vector.broadcast %22 : vector<2x1x128xf32> to vector<2x8x128xf32>
    %24 = arith.addf %21, %23 : vector<2x8x128xf32>
    %c0_25 = arith.constant 0 : index
    %c0_26 = arith.constant 0 : index
    %c0_27 = arith.constant 0 : index
    %25 = vector.load %arg14[%c0_25, %c0_26, %c0_27] : memref<1x1x8xf32, #tpu.memory_space<vmem>>, vector<1x1x8xf32>
    %26 = vector.shape_cast %25 : vector<1x1x8xf32> to vector<1x8xf32>
    %cst_28 = arith.constant 5.000000e-01 : f32
    %27 = vector.broadcast %cst_28 : f32 to vector<1x8xf32>
    %28 = arith.cmpf ogt, %26, %27 : vector<1x8xf32>
    %cst_29 = arith.constant -1.000000e+30 : f32
    %cst_30 = arith.constant 0.000000e+00 : f32
    %29 = vector.broadcast %cst_29 : f32 to vector<1x8xf32>
    %30 = vector.broadcast %cst_30 : f32 to vector<1x8xf32>
    %31 = arith.select %28, %29, %30 : vector<1x8xi1>, vector<1x8xf32>
    %32 = vector.shape_cast %31 : vector<1x8xf32> to vector<1x8xf32>
    %33 = vector.broadcast %32 : vector<1x8xf32> to vector<8x8xf32>
    %c8_i32 = arith.constant 8 : i32
    %34 = arith.muli %arg1, %c8_i32 : i32
    %35 = tpu.iota {dimensions = array<i32: 0>} : vector<8x8xi32>
    %36 = vector.broadcast %34 : i32 to vector<8x8xi32>
    %37 = arith.addi %36, %35 : vector<8x8xi32>
    %38 = tpu.iota {dimensions = array<i32: 1>} : vector<8x8xi32>
    %39 = arith.cmpi sgt, %38, %37 : vector<8x8xi32>
    %cst_31 = arith.constant -1.000000e+30 : f32
    %40 = vector.broadcast %cst_31 : f32 to vector<8x8xf32>
    %41 = arith.select %39, %40, %33 : vector<8x8xi1>, vector<8x8xf32>
    %42 = arith.truncf %14 : vector<2x8x128xf32> to vector<2x8x128xbf16>
    %43 = arith.truncf %19 : vector<2x8x128xf32> to vector<2x8x128xbf16>
    %cst_32 = arith.constant dense<0.000000e+00> : vector<2x8x8xf32>
    %44 = tpu.matmul %42, %43, %cst_32 {dimension_numbers = #tpu.dot_dimension_numbers<[2], [2], [1], [1], [0, 0, 0, 1, 1, 1], [0], [0]>} : vector<2x8x128xbf16>, vector<2x8x128xbf16>, vector<2x8x8xf32> -> vector<2x8x8xf32>
    %45 = vector.shape_cast %41 : vector<8x8xf32> to vector<1x8x8xf32>
    %46 = vector.broadcast %45 : vector<1x8x8xf32> to vector<2x8x8xf32>
    %47 = arith.addf %44, %46 : vector<2x8x8xf32>
    %cst_33 = arith.constant dense<0xFF800000> : vector<2x8xf32>
    %48 = vector.multi_reduction <maximumf>, %47, %cst_33 [2] : vector<2x8x8xf32> to vector<2x8xf32>
    %49 = vector.shape_cast %48 : vector<2x8xf32> to vector<2x8x1xf32>
    %50 = vector.broadcast %49 : vector<2x8x1xf32> to vector<2x8x8xf32>
    %51 = arith.subf %47, %50 : vector<2x8x8xf32>
    %52 = math.exp %51 : vector<2x8x8xf32>
    %cst_34 = arith.constant dense<0.000000e+00> : vector<2x8xf32>
    %53 = vector.multi_reduction <add>, %52, %cst_34 [2] : vector<2x8x8xf32> to vector<2x8xf32>
    %54 = vector.shape_cast %53 : vector<2x8xf32> to vector<2x8x1xf32>
    %55 = tpu.reciprocal %54 {approx = true} : vector<2x8x1xf32> -> vector<2x8x1xf32>
    %56 = vector.broadcast %55 : vector<2x8x1xf32> to vector<2x8x8xf32>
    %57 = arith.mulf %52, %56 : vector<2x8x8xf32>
    %58 = arith.truncf %57 : vector<2x8x8xf32> to vector<2x8x8xbf16>
    %59 = arith.truncf %24 : vector<2x8x128xf32> to vector<2x8x128xbf16>
    %cst_35 = arith.constant dense<0.000000e+00> : vector<2x8x128xf32>
    %60 = tpu.matmul %58, %59, %cst_35 {dimension_numbers = #tpu.dot_dimension_numbers<[2], [1], [1], [2], [0, 0, 0, 1, 1, 2], [0], [0]>} : vector<2x8x8xbf16>, vector<2x8x128xbf16>, vector<2x8x128xf32> -> vector<2x8x128xf32>
    %61 = arith.truncf %60 : vector<2x8x128xf32> to vector<2x8x128xbf16>
    %c0_36 = arith.constant 0 : index
    %c0_37 = arith.constant 0 : index
    %c0_38 = arith.constant 0 : index
    %62 = vector.load %arg10[%c0_36, %c0_37, %c0_38] : memref<2x128x32xbf16, #tpu.memory_space<vmem>>, vector<2x128x32xbf16>
    %cst_39 = arith.constant dense<0.000000e+00> : vector<2x8x32xf32>
    %63 = tpu.matmul %61, %62, %cst_39 {dimension_numbers = #tpu.dot_dimension_numbers<[2], [1], [1], [2], [0, 0, 0, 1, 1, 2], [0], [0]>} : vector<2x8x128xbf16>, vector<2x128x32xbf16>, vector<2x8x32xf32> -> vector<2x8x32xf32>
    %cst_40 = arith.constant dense<0.000000e+00> : vector<8x32xf32>
    %64 = vector.multi_reduction <add>, %63, %cst_40 [0] : vector<2x8x32xf32> to vector<8x32xf32>
    %c0_41 = arith.constant 0 : index
    %c0_42 = arith.constant 0 : index
    %65 = vector.load %arg11[%c0_41, %c0_42] : memref<1x32xf32, #tpu.memory_space<vmem>>, vector<1x32xf32>
    %66 = vector.broadcast %65 : vector<1x32xf32> to vector<8x32xf32>
    %67 = arith.addf %64, %66 : vector<8x32xf32>
    %68 = arith.extf %1 : vector<8x32xbf16> to vector<8x32xf32>
    %69 = arith.addf %67, %68 : vector<8x32xf32>
    %c0_43 = arith.constant 0 : index
    %c0_44 = arith.constant 0 : index
    %70 = vector.load %arg12[%c0_43, %c0_44] : memref<1x32xf32, #tpu.memory_space<vmem>>, vector<1x32xf32>
    %c0_45 = arith.constant 0 : index
    %c0_46 = arith.constant 0 : index
    %71 = vector.load %arg13[%c0_45, %c0_46] : memref<1x32xf32, #tpu.memory_space<vmem>>, vector<1x32xf32>
    %cst_47 = arith.constant dense<0.000000e+00> : vector<8xf32>
    %72 = vector.multi_reduction <add>, %69, %cst_47 [1] : vector<8x32xf32> to vector<8xf32>
    %73 = vector.shape_cast %72 : vector<8xf32> to vector<8x1xf32>
    %cst_48 = arith.constant 3.200000e+01 : f32
    %74 = vector.broadcast %cst_48 : f32 to vector<8x1xf32>
    %75 = arith.divf %73, %74 : vector<8x1xf32>
    %76 = vector.broadcast %75 : vector<8x1xf32> to vector<8x32xf32>
    %77 = arith.subf %69, %76 : vector<8x32xf32>
    %78 = arith.mulf %77, %77 : vector<8x32xf32>
    %cst_49 = arith.constant dense<0.000000e+00> : vector<8xf32>
    %79 = vector.multi_reduction <add>, %78, %cst_49 [1] : vector<8x32xf32> to vector<8xf32>
    %80 = vector.shape_cast %79 : vector<8xf32> to vector<8x1xf32>
    %cst_50 = arith.constant 3.200000e+01 : f32
    %81 = vector.broadcast %cst_50 : f32 to vector<8x1xf32>
    %82 = arith.divf %80, %81 : vector<8x1xf32>
    %83 = vector.broadcast %75 : vector<8x1xf32> to vector<8x32xf32>
    %84 = arith.subf %69, %83 : vector<8x32xf32>
    %cst_51 = arith.constant 9.99999974E-6 : f32
    %85 = vector.broadcast %cst_51 : f32 to vector<8x1xf32>
    %86 = arith.addf %82, %85 : vector<8x1xf32>
    %87 = math.rsqrt %86 : vector<8x1xf32>
    %88 = vector.broadcast %87 : vector<8x1xf32> to vector<8x32xf32>
    %89 = arith.mulf %84, %88 : vector<8x32xf32>
    %90 = vector.broadcast %70 : vector<1x32xf32> to vector<8x32xf32>
    %91 = arith.mulf %89, %90 : vector<8x32xf32>
    %92 = vector.broadcast %71 : vector<1x32xf32> to vector<8x32xf32>
    %93 = arith.addf %91, %92 : vector<8x32xf32>
    %c0_52 = arith.constant 0 : index
    %c0_53 = arith.constant 0 : index
    %c0_54 = arith.constant 0 : index
    %94 = vector.load %arg15[%c0_52, %c0_53, %c0_54] : memref<1x8x1xf32, #tpu.memory_space<vmem>>, vector<1x8x1xf32>
    %95 = vector.shape_cast %94 : vector<1x8x1xf32> to vector<8x1xf32>
    %96 = vector.broadcast %95 : vector<8x1xf32> to vector<8x32xf32>
    %97 = arith.mulf %93, %96 : vector<8x32xf32>
    %98 = arith.truncf %97 : vector<8x32xf32> to vector<8x32xbf16>
    %c0_55 = arith.constant 0 : index
    %c0_56 = arith.constant 0 : index
    %c0_57 = arith.constant 0 : index
    %99 = vector.load %arg16[%c0_55, %c0_56, %c0_57] : memref<1x8x32xbf16, #tpu.memory_space<vmem>>, vector<1x8x32xbf16>
    %100 = vector.shape_cast %99 : vector<1x8x32xbf16> to vector<8x32xbf16>
    %101 = vector.shape_cast %98 : vector<8x32xbf16> to vector<1x8x32xbf16>
    tpu.vector_store %arg16[%c0_55, %c0_56, %c0_57], %101 {strides = array<i32>} : memref<1x8x32xbf16, #tpu.memory_space<vmem>>, vector<1x8x32xbf16>,
    return
  }
  func.func @transform_0(%arg0: i32, %arg1: i32) -> (i32, i32, i32) {
    %c0_i32 = arith.constant 0 : i32
    %c0_i32_0 = arith.constant 0 : i32
    return %arg0, %arg1, %c0_i32 : i32, i32, i32
  }
  func.func @transform_1(%arg0: i32, %arg1: i32) -> (i32, i32, i32) {
    %c0_i32 = arith.constant 0 : i32
    %c0_i32_0 = arith.constant 0 : i32
    %c0_i32_1 = arith.constant 0 : i32
    return %arg0, %c0_i32, %c0_i32_0 : i32, i32, i32
  }
  func.func @transform_2(%arg0: i32, %arg1: i32) -> (i32, i32, i32) {
    %c0_i32 = arith.constant 0 : i32
    %c0_i32_0 = arith.constant 0 : i32
    %c0_i32_1 = arith.constant 0 : i32
    %c0_i32_2 = arith.constant 0 : i32
    return %c0_i32, %c0_i32_0, %c0_i32_1 : i32, i32, i32
  }
  func.func @transform_3(%arg0: i32, %arg1: i32) -> (i32, i32, i32) {
    %c0_i32 = arith.constant 0 : i32
    %c0_i32_0 = arith.constant 0 : i32
    %c0_i32_1 = arith.constant 0 : i32
    %c0_i32_2 = arith.constant 0 : i32
    return %c0_i32, %c0_i32_0, %c0_i32_1 : i32, i32, i32
  }
  func.func @transform_4(%arg0: i32, %arg1: i32) -> (i32, i32, i32) {
    %c0_i32 = arith.constant 0 : i32
    %c0_i32_0 = arith.constant 0 : i32
    %c0_i32_1 = arith.constant 0 : i32
    %c0_i32_2 = arith.constant 0 : i32
    return %c0_i32, %c0_i32_0, %c0_i32_1 : i32, i32, i32
  }
  func.func @transform_5(%arg0: i32, %arg1: i32) -> (i32, i32, i32) {
    %c0_i32 = arith.constant 0 : i32
    %c0_i32_0 = arith.constant 0 : i32
    %c0_i32_1 = arith.constant 0 : i32
    %c0_i32_2 = arith.constant 0 : i32
    return %c0_i32, %c0_i32_0, %c0_i32_1 : i32, i32, i32
  }
  func.func @transform_6(%arg0: i32, %arg1: i32) -> (i32, i32, i32) {
    %c0_i32 = arith.constant 0 : i32
    %c0_i32_0 = arith.constant 0 : i32
    %c0_i32_1 = arith.constant 0 : i32
    %c0_i32_2 = arith.constant 0 : i32
    return %c0_i32, %c0_i32_0, %c0_i32_1 : i32, i32, i32
  }
  func.func @transform_7(%arg0: i32, %arg1: i32) -> (i32, i32, i32) {
    %c0_i32 = arith.constant 0 : i32
    %c0_i32_0 = arith.constant 0 : i32
    %c0_i32_1 = arith.constant 0 : i32
    %c0_i32_2 = arith.constant 0 : i32
    return %c0_i32, %c0_i32_0, %c0_i32_1 : i32, i32, i32
  }
  func.func @transform_8(%arg0: i32, %arg1: i32) -> (i32, i32, i32) {
    %c0_i32 = arith.constant 0 : i32
    %c0_i32_0 = arith.constant 0 : i32
    %c0_i32_1 = arith.constant 0 : i32
    %c0_i32_2 = arith.constant 0 : i32
    return %c0_i32, %c0_i32_0, %c0_i32_1 : i32, i32, i32
  }
  func.func @transform_9(%arg0: i32, %arg1: i32) -> (i32, i32) {
    %c0_i32 = arith.constant 0 : i32
    %c0_i32_0 = arith.constant 0 : i32
    %c0_i32_1 = arith.constant 0 : i32
    return %c0_i32, %c0_i32_0 : i32, i32
  }
  func.func @transform_10(%arg0: i32, %arg1: i32) -> (i32, i32) {
    %c0_i32 = arith.constant 0 : i32
    %c0_i32_0 = arith.constant 0 : i32
    %c0_i32_1 = arith.constant 0 : i32
    return %c0_i32, %c0_i32_0 : i32, i32
  }
  func.func @transform_11(%arg0: i32, %arg1: i32) -> (i32, i32) {
    %c0_i32 = arith.constant 0 : i32
    %c0_i32_0 = arith.constant 0 : i32
    %c0_i32_1 = arith.constant 0 : i32
    return %c0_i32, %c0_i32_0 : i32, i32
  }
  func.func @transform_12(%arg0: i32, %arg1: i32) -> (i32, i32, i32) {
    %c0_i32 = arith.constant 0 : i32
    %c0_i32_0 = arith.constant 0 : i32
    %c0_i32_1 = arith.constant 0 : i32
    return %arg0, %c0_i32, %c0_i32_0 : i32, i32, i32
  }
  func.func @transform_13(%arg0: i32, %arg1: i32) -> (i32, i32, i32) {
    %c0_i32 = arith.constant 0 : i32
    %c0_i32_0 = arith.constant 0 : i32
    return %arg0, %arg1, %c0_i32 : i32, i32, i32
  }
  func.func @transform_14(%arg0: i32, %arg1: i32) -> (i32, i32, i32) {
    %c0_i32 = arith.constant 0 : i32
    %c0_i32_0 = arith.constant 0 : i32
    return %arg0, %arg1, %c0_i32 : i32, i32, i32
  }
}

module attributes {stable_mosaic.version = 11 : i64} {
  func.func @_matmul_bias_kernel(%arg0: i32, %arg1: i32, %arg2: i32, %arg3: memref<16x32xbf16, #tpu.memory_space<vmem>>, %arg4: memref<32x128xbf16, #tpu.memory_space<vmem>>, %arg5: memref<1x128xf32, #tpu.memory_space<vmem>>, %arg6: memref<16x128xbf16, #tpu.memory_space<vmem>>, %arg7: memref<16x128xf32, #tpu.memory_space<vmem>>) attributes {dimension_semantics = [#tpu.dimension_semantics<parallel>, #tpu.dimension_semantics<parallel>, #tpu.dimension_semantics<arbitrary>], iteration_bounds = array<i64: 1, 1, 1>, scalar_prefetch = 0 : i64, scratch_operands = 1 : i64, tpu.core_type = #tpu.core_type<tc>, window_params = [{transform_indices = @transform_0, window_bounds = array<i64: 16, 32>}, {transform_indices = @transform_1, window_bounds = array<i64: 32, 128>}, {transform_indices = @transform_2, window_bounds = array<i64: 1, 128>}, {transform_indices = @transform_3, window_bounds = array<i64: 16, 128>}]} {
    %c0_i32 = arith.constant 0 : i32
    %0 = arith.cmpi eq, %arg2, %c0_i32 : i32
    %1 = arith.extui %0 : i1 to i32
    %c0_i32_0 = arith.constant 0 : i32
    %2 = arith.cmpi ne, %1, %c0_i32_0 : i32
    scf.if %2 {
      %cst_10 = arith.constant 0.000000e+00 : f32
      %12 = vector.broadcast %cst_10 : f32 to vector<16x128xf32>
      %c0_11 = arith.constant 0 : index
      %c0_12 = arith.constant 0 : index
      %13 = vector.load %arg7[%c0_11, %c0_12] : memref<16x128xf32, #tpu.memory_space<vmem>>, vector<16x128xf32>
      tpu.vector_store %arg7[%c0_11, %c0_12], %12 {strides = array<i32>} : memref<16x128xf32, #tpu.memory_space<vmem>>, vector<16x128xf32>,
    } else {
    }
    %c0 = arith.constant 0 : index
    %c0_1 = arith.constant 0 : index
    %3 = vector.load %arg7[%c0, %c0_1] : memref<16x128xf32, #tpu.memory_space<vmem>>, vector<16x128xf32>
    %c0_2 = arith.constant 0 : index
    %c0_3 = arith.constant 0 : index
    %4 = vector.load %arg3[%c0_2, %c0_3] : memref<16x32xbf16, #tpu.memory_space<vmem>>, vector<16x32xbf16>
    %c0_4 = arith.constant 0 : index
    %c0_5 = arith.constant 0 : index
    %5 = vector.load %arg4[%c0_4, %c0_5] : memref<32x128xbf16, #tpu.memory_space<vmem>>, vector<32x128xbf16>
    %cst = arith.constant dense<0.000000e+00> : vector<16x128xf32>
    %6 = tpu.matmul %4, %5, %cst {dimension_numbers = #tpu.dot_dimension_numbers<[1], [0], [0], [1], [0, 0, 1, 1], [], []>} : vector<16x32xbf16>, vector<32x128xbf16>, vector<16x128xf32> -> vector<16x128xf32>
    %7 = arith.addf %3, %6 : vector<16x128xf32>
    %c0_6 = arith.constant 0 : index
    %c0_7 = arith.constant 0 : index
    %8 = vector.load %arg7[%c0_6, %c0_7] : memref<16x128xf32, #tpu.memory_space<vmem>>, vector<16x128xf32>
    tpu.vector_store %arg7[%c0_6, %c0_7], %7 {strides = array<i32>} : memref<16x128xf32, #tpu.memory_space<vmem>>, vector<16x128xf32>,
    %c0_i32_8 = arith.constant 0 : i32
    %9 = arith.cmpi eq, %arg2, %c0_i32_8 : i32
    %10 = arith.extui %9 : i1 to i32
    %c0_i32_9 = arith.constant 0 : i32
    %11 = arith.cmpi ne, %10, %c0_i32_9 : i32
    scf.if %11 {
      %c0_10 = arith.constant 0 : index
      %c0_11 = arith.constant 0 : index
      %12 = vector.load %arg7[%c0_10, %c0_11] : memref<16x128xf32, #tpu.memory_space<vmem>>, vector<16x128xf32>
      %c0_12 = arith.constant 0 : index
      %c0_13 = arith.constant 0 : index
      %13 = vector.load %arg5[%c0_12, %c0_13] : memref<1x128xf32, #tpu.memory_space<vmem>>, vector<1x128xf32>
      %14 = vector.broadcast %13 : vector<1x128xf32> to vector<16x128xf32>
      %15 = arith.addf %12, %14 : vector<16x128xf32>
      %16 = arith.truncf %15 : vector<16x128xf32> to vector<16x128xbf16>
      %c0_14 = arith.constant 0 : index
      %c0_15 = arith.constant 0 : index
      %17 = vector.load %arg6[%c0_14, %c0_15] : memref<16x128xbf16, #tpu.memory_space<vmem>>, vector<16x128xbf16>
      tpu.vector_store %arg6[%c0_14, %c0_15], %16 {strides = array<i32>} : memref<16x128xbf16, #tpu.memory_space<vmem>>, vector<16x128xbf16>,
    } else {
    }
    return
  }
  func.func @transform_0(%arg0: i32, %arg1: i32, %arg2: i32) -> (i32, i32) {
    %c0_i32 = arith.constant 0 : i32
    return %arg0, %arg2 : i32, i32
  }
  func.func @transform_1(%arg0: i32, %arg1: i32, %arg2: i32) -> (i32, i32) {
    %c0_i32 = arith.constant 0 : i32
    return %arg2, %arg1 : i32, i32
  }
  func.func @transform_2(%arg0: i32, %arg1: i32, %arg2: i32) -> (i32, i32) {
    %c0_i32 = arith.constant 0 : i32
    %c0_i32_0 = arith.constant 0 : i32
    return %c0_i32, %arg1 : i32, i32
  }
  func.func @transform_3(%arg0: i32, %arg1: i32, %arg2: i32) -> (i32, i32) {
    %c0_i32 = arith.constant 0 : i32
    return %arg0, %arg1 : i32, i32
  }
}

module attributes {stable_mosaic.version = 11 : i64} {
  func.func @_ffn_sublayer_kernel(%arg0: i32, %arg1: memref<16x32xbf16, #tpu.memory_space<vmem>>, %arg2: memref<32x64xbf16, #tpu.memory_space<vmem>>, %arg3: memref<1x64xf32, #tpu.memory_space<vmem>>, %arg4: memref<64x32xbf16, #tpu.memory_space<vmem>>, %arg5: memref<1x32xf32, #tpu.memory_space<vmem>>, %arg6: memref<1x32xf32, #tpu.memory_space<vmem>>, %arg7: memref<1x32xf32, #tpu.memory_space<vmem>>, %arg8: memref<16x1xf32, #tpu.memory_space<vmem>>, %arg9: memref<16x32xbf16, #tpu.memory_space<vmem>>) attributes {dimension_semantics = [#tpu.dimension_semantics<parallel>], iteration_bounds = array<i64: 1>, scalar_prefetch = 0 : i64, scratch_operands = 0 : i64, tpu.core_type = #tpu.core_type<tc>, window_params = [{transform_indices = @transform_0, window_bounds = array<i64: 16, 32>}, {pipeline_mode = #tpu.pipeline_mode<synchronous>, transform_indices = @transform_1, window_bounds = array<i64: 32, 64>}, {pipeline_mode = #tpu.pipeline_mode<synchronous>, transform_indices = @transform_2, window_bounds = array<i64: 1, 64>}, {pipeline_mode = #tpu.pipeline_mode<synchronous>, transform_indices = @transform_3, window_bounds = array<i64: 64, 32>}, {pipeline_mode = #tpu.pipeline_mode<synchronous>, transform_indices = @transform_4, window_bounds = array<i64: 1, 32>}, {pipeline_mode = #tpu.pipeline_mode<synchronous>, transform_indices = @transform_5, window_bounds = array<i64: 1, 32>}, {pipeline_mode = #tpu.pipeline_mode<synchronous>, transform_indices = @transform_6, window_bounds = array<i64: 1, 32>}, {transform_indices = @transform_7, window_bounds = array<i64: 16, 1>}, {transform_indices = @transform_8, window_bounds = array<i64: 16, 32>}]} {
    %c0 = arith.constant 0 : index
    %c0_0 = arith.constant 0 : index
    %0 = vector.load %arg1[%c0, %c0_0] : memref<16x32xbf16, #tpu.memory_space<vmem>>, vector<16x32xbf16>
    %c0_1 = arith.constant 0 : index
    %c0_2 = arith.constant 0 : index
    %1 = vector.load %arg2[%c0_1, %c0_2] : memref<32x64xbf16, #tpu.memory_space<vmem>>, vector<32x64xbf16>
    %cst = arith.constant dense<0.000000e+00> : vector<16x64xf32>
    %2 = tpu.matmul %0, %1, %cst {dimension_numbers = #tpu.dot_dimension_numbers<[1], [0], [0], [1], [0, 0, 1, 1], [], []>} : vector<16x32xbf16>, vector<32x64xbf16>, vector<16x64xf32> -> vector<16x64xf32>
    %c0_3 = arith.constant 0 : index
    %c0_4 = arith.constant 0 : index
    %3 = vector.load %arg3[%c0_3, %c0_4] : memref<1x64xf32, #tpu.memory_space<vmem>>, vector<1x64xf32>
    %4 = vector.broadcast %3 : vector<1x64xf32> to vector<16x64xf32>
    %5 = arith.addf %2, %4 : vector<16x64xf32>
    %cst_5 = arith.constant 0.000000e+00 : f32
    %6 = vector.broadcast %cst_5 : f32 to vector<16x64xf32>
    %7 = arith.maximumf %5, %6 : vector<16x64xf32>
    %8 = arith.truncf %7 : vector<16x64xf32> to vector<16x64xbf16>
    %c0_6 = arith.constant 0 : index
    %c0_7 = arith.constant 0 : index
    %9 = vector.load %arg4[%c0_6, %c0_7] : memref<64x32xbf16, #tpu.memory_space<vmem>>, vector<64x32xbf16>
    %cst_8 = arith.constant dense<0.000000e+00> : vector<16x32xf32>
    %10 = tpu.matmul %8, %9, %cst_8 {dimension_numbers = #tpu.dot_dimension_numbers<[1], [0], [0], [1], [0, 0, 1, 1], [], []>} : vector<16x64xbf16>, vector<64x32xbf16>, vector<16x32xf32> -> vector<16x32xf32>
    %c0_9 = arith.constant 0 : index
    %c0_10 = arith.constant 0 : index
    %11 = vector.load %arg5[%c0_9, %c0_10] : memref<1x32xf32, #tpu.memory_space<vmem>>, vector<1x32xf32>
    %12 = vector.broadcast %11 : vector<1x32xf32> to vector<16x32xf32>
    %13 = arith.addf %10, %12 : vector<16x32xf32>
    %14 = arith.extf %0 : vector<16x32xbf16> to vector<16x32xf32>
    %15 = arith.addf %13, %14 : vector<16x32xf32>
    %c0_11 = arith.constant 0 : index
    %c0_12 = arith.constant 0 : index
    %16 = vector.load %arg6[%c0_11, %c0_12] : memref<1x32xf32, #tpu.memory_space<vmem>>, vector<1x32xf32>
    %c0_13 = arith.constant 0 : index
    %c0_14 = arith.constant 0 : index
    %17 = vector.load %arg7[%c0_13, %c0_14] : memref<1x32xf32, #tpu.memory_space<vmem>>, vector<1x32xf32>
    %cst_15 = arith.constant dense<0.000000e+00> : vector<16xf32>
    %18 = vector.multi_reduction <add>, %15, %cst_15 [1] : vector<16x32xf32> to vector<16xf32>
    %19 = vector.shape_cast %18 : vector<16xf32> to vector<16x1xf32>
    %cst_16 = arith.constant 3.200000e+01 : f32
    %20 = vector.broadcast %cst_16 : f32 to vector<16x1xf32>
    %21 = arith.divf %19, %20 : vector<16x1xf32>
    %22 = vector.broadcast %21 : vector<16x1xf32> to vector<16x32xf32>
    %23 = arith.subf %15, %22 : vector<16x32xf32>
    %24 = arith.mulf %23, %23 : vector<16x32xf32>
    %cst_17 = arith.constant dense<0.000000e+00> : vector<16xf32>
    %25 = vector.multi_reduction <add>, %24, %cst_17 [1] : vector<16x32xf32> to vector<16xf32>
    %26 = vector.shape_cast %25 : vector<16xf32> to vector<16x1xf32>
    %cst_18 = arith.constant 3.200000e+01 : f32
    %27 = vector.broadcast %cst_18 : f32 to vector<16x1xf32>
    %28 = arith.divf %26, %27 : vector<16x1xf32>
    %29 = vector.broadcast %21 : vector<16x1xf32> to vector<16x32xf32>
    %30 = arith.subf %15, %29 : vector<16x32xf32>
    %cst_19 = arith.constant 9.99999974E-6 : f32
    %31 = vector.broadcast %cst_19 : f32 to vector<16x1xf32>
    %32 = arith.addf %28, %31 : vector<16x1xf32>
    %33 = math.rsqrt %32 : vector<16x1xf32>
    %34 = vector.broadcast %33 : vector<16x1xf32> to vector<16x32xf32>
    %35 = arith.mulf %30, %34 : vector<16x32xf32>
    %36 = vector.broadcast %16 : vector<1x32xf32> to vector<16x32xf32>
    %37 = arith.mulf %35, %36 : vector<16x32xf32>
    %38 = vector.broadcast %17 : vector<1x32xf32> to vector<16x32xf32>
    %39 = arith.addf %37, %38 : vector<16x32xf32>
    %c0_20 = arith.constant 0 : index
    %c0_21 = arith.constant 0 : index
    %40 = vector.load %arg8[%c0_20, %c0_21] : memref<16x1xf32, #tpu.memory_space<vmem>>, vector<16x1xf32>
    %41 = vector.broadcast %40 : vector<16x1xf32> to vector<16x32xf32>
    %42 = arith.mulf %39, %41 : vector<16x32xf32>
    %43 = arith.truncf %42 : vector<16x32xf32> to vector<16x32xbf16>
    %c0_22 = arith.constant 0 : index
    %c0_23 = arith.constant 0 : index
    %44 = vector.load %arg9[%c0_22, %c0_23] : memref<16x32xbf16, #tpu.memory_space<vmem>>, vector<16x32xbf16>
    tpu.vector_store %arg9[%c0_22, %c0_23], %43 {strides = array<i32>} : memref<16x32xbf16, #tpu.memory_space<vmem>>, vector<16x32xbf16>,
    return
  }
  func.func @transform_0(%arg0: i32) -> (i32, i32) {
    %c0_i32 = arith.constant 0 : i32
    %c0_i32_0 = arith.constant 0 : i32
    return %arg0, %c0_i32 : i32, i32
  }
  func.func @transform_1(%arg0: i32) -> (i32, i32) {
    %c0_i32 = arith.constant 0 : i32
    %c0_i32_0 = arith.constant 0 : i32
    %c0_i32_1 = arith.constant 0 : i32
    return %c0_i32, %c0_i32_0 : i32, i32
  }
  func.func @transform_2(%arg0: i32) -> (i32, i32) {
    %c0_i32 = arith.constant 0 : i32
    %c0_i32_0 = arith.constant 0 : i32
    %c0_i32_1 = arith.constant 0 : i32
    return %c0_i32, %c0_i32_0 : i32, i32
  }
  func.func @transform_3(%arg0: i32) -> (i32, i32) {
    %c0_i32 = arith.constant 0 : i32
    %c0_i32_0 = arith.constant 0 : i32
    %c0_i32_1 = arith.constant 0 : i32
    return %c0_i32, %c0_i32_0 : i32, i32
  }
  func.func @transform_4(%arg0: i32) -> (i32, i32) {
    %c0_i32 = arith.constant 0 : i32
    %c0_i32_0 = arith.constant 0 : i32
    %c0_i32_1 = arith.constant 0 : i32
    return %c0_i32, %c0_i32_0 : i32, i32
  }
  func.func @transform_5(%arg0: i32) -> (i32, i32) {
    %c0_i32 = arith.constant 0 : i32
    %c0_i32_0 = arith.constant 0 : i32
    %c0_i32_1 = arith.constant 0 : i32
    return %c0_i32, %c0_i32_0 : i32, i32
  }
  func.func @transform_6(%arg0: i32) -> (i32, i32) {
    %c0_i32 = arith.constant 0 : i32
    %c0_i32_0 = arith.constant 0 : i32
    %c0_i32_1 = arith.constant 0 : i32
    return %c0_i32, %c0_i32_0 : i32, i32
  }
  func.func @transform_7(%arg0: i32) -> (i32, i32) {
    %c0_i32 = arith.constant 0 : i32
    %c0_i32_0 = arith.constant 0 : i32
    return %arg0, %c0_i32 : i32, i32
  }
  func.func @transform_8(%arg0: i32) -> (i32, i32) {
    %c0_i32 = arith.constant 0 : i32
    %c0_i32_0 = arith.constant 0 : i32
    return %arg0, %c0_i32 : i32, i32
  }
}

</mosaic_0001>

<bundles_post_ra>
// kernel: tpu_custom_call.1
= control target key start
LH: loop header
LB: loop body
LE: loop exit
PB: predicated region body
PF: predicated region fallthrough
CT: control target
= control target key end

     0   :  { %7 = vsyncpa [#allocation3], 0  ;;  %s692_s0 = inlined_call_operand.hbm [shape: f32[8,128], index: 0, kind: input, shape index: {}]   ;;  %s693_s1 = inlined_call_operand.hbm [shape: f32[16,128], index: 1, kind: input, shape index: {}]   ;;  %s694_s2 = inlined_call_operand.hbm [shape: f32[16,128], index: 2, kind: output, shape index: {}]  }
   0x1   :  { %8 = vsyncpa [#allocation6], 0 }
   0x2   :  { %10 = vsyncpa [#allocation6 + $0x1], 0 }
   0x3   :  { %11 = vsyncpa [#allocation4], 0 }
   0x4   :  { %13 = vsyncpa [#allocation4 + $0x1], 0  ;;  %s491_s9 = smov 0   ;;  %s493_s10 = smov 0  }
   0x5   :  { %s495_s11 = smov 0   ;;  %s497_s12 = smov 0  }
   0x6 LB: > { %s512_s13 = sadd.s32 4294967295, %s471_s12   ;;  %s272_s14 = sadd.s32 4294967294, %s471_s12   ;;  %s471_s12 = sphi %s497_s12, %s718_s12   ;;  %s467_s11 = sphi %s495_s11, %s717_s11   ;;  %s463_s10 = sphi %s493_s10, %s716_s10   ;;  %s459_s9 = sphi %s491_s9, %s715_s9  }
   0x7   : > { %p60_p0 = scmp.ne.s32.totalorder %s463_s10, %s459_s9  ;;  %p695_p1 = scmp.eq.s32.totalorder %s512_s13, 0 }
   0x8   : > { %p90_p3 = scmp.eq.s32.totalorder %s272_s14, 1  ;;  %p273_p5 = scmp.ge.s32.totalorder %s471_s12, 1 }
   0x9   : > { %p521_p4 = por %p695_p1, %p60_p0  ;;  %p97_p7 = scmp.lt.s32.totalorder %s471_s12, 3 }
   0xa   : > { %p526_p6 = por %p90_p3, %p60_p0  ;;  %s473_s18 = smov [#allocation2]  }
   0xb   : > { %s698_s15 = scalar_select %p521_p4, 1, 0 }
   0xc   : > { %s699_s16 = scalar_select %p526_p6, 1, 0 }
   0xd   : > { %p531_p8 = pnand %p273_p5, %p97_p7  ;;  %s110_s19 = sshll.u32 %s473_s18, 4  ;;  %s111_s19 = int_to_ptr.vmem [resolvable:$true] %s110_s19 }
   0xe   : > { %s539_s20 = sadd.s32 1, %s471_s12   ;;  %s47_s24 = sadd.s32 1, %s467_s11 }
   0xf   : > { %s700_s17 = scalar_select %p531_p8, 1, 0 }
  0x10   : > { %p294_p10 = pneg %p531_p8  ;;  %s44_s22 = ssub.s32 %s471_s12, %s539_s20 }
  0x11   : > { %p549_p12 = scmp.eq.s32.totalorder %s44_s22, 0  ;;  %s343_s27 = scalar_lea.hbm %s692_s0, 128 }
  0x12   : > { %p543_p11 = pnand %p294_p10, %p695_p1  ;;  %p344_p0 = scmp.ne.s32.totalorder %s692_s0, %s343_s27 }
  0x13   : > { %s702_s23 = scalar_select %p549_p12, 1, 0 }
  0x14   : > { %p345_p3 = pneg %p543_p11  ;;  %p350_p10 = scmp.lt.u32.totalorder %s343_s27, %s692_s0 }
  0x16   : > { %p346_p5 = pnand %p345_p3, %p344_p0 }
  0x18   : > { %p347_p7 = pneg %p346_p5 }
  0x1a   : > { %p352_p9 = pnand %p350_p10, %p347_p7 }
  0x1c   : > { %355 = shalt.err (!%p352_p9)
}
  0x1d   : > { %s356_s4 = scalar_lea.vmem %s111_s19, 128  ;;  %p364_p6 = scmp.lt.s32.totalorder %s111_s19, %s111_s19 }
  0x1e   : > { %p357_p1 = scmp.ne.s32.totalorder %s111_s19, %s356_s4  ;;  %p365_p4 = scmp.lt.s32.totalorder %s356_s4, %s356_s4 }
  0x20   : > { %p359_p2 = pnand %p357_p1, %p345_p3  ;;  %p366_p8 = por %p365_p4, %p364_p6 }
  0x22   : > { %p360_p13 = pneg %p359_p2 }
  0x24   : > { %p367_p12 = pnand %p366_p8, %p360_p13 }
  0x26   : > { %370 = shalt.err (!%p367_p12)
}
  0x27   : > { %297 = dma.hbm_to_vmem [thread:$0]  (!%p543_p11), %s692_s0, 128, %s111_s19, [#allocation3]  }
  0x28   : > { %p703_p1 = scmp.ne.s32.totalorder %s702_s23, 0  ;;  %p55_p2 = scmp.eq.s32.totalorder %s471_s12, 0 }
  0x29   : > { %p704_p4 = scmp.ne.s32.totalorder %s467_s11, %s463_s10  ;;  %p705_p6 = scmp.eq.s32.totalorder %s512_s13, 1 }
  0x2a   : > { %s575_s7 = scalar_select %p703_p1, %s467_s11, %s47_s24  }
  0x2b   : > { %p583_p8 = por %p705_p6, %p704_p4  ;;  %p307_p9 = scmp.lt.s32.totalorder %s471_s12, 2 }
  0x2c   : > { %s121_s14 = sand.u32 1, %s467_s11   ;;  %p707_p12 = pmov %p704_p4 }
  0x2d   : > { %s276_s18 = sshll.u32 %s121_s14, 3  ;;  %s277_s21 = sshll.u32 %s471_s12, 7 }
  0x2e   : > { %p56_p13 = por %p55_p2, %p707_p12  ;;  %s596_s19 = scalar_lea.hbm %s693_s1, %s277_s21 }
  0x2f   : > { %s125_s23 = scalar_lea.vmem [#allocation5], %s276_s18  ;;  %s122_s27 = scalar_lea.sflag [#allocation6], %s121_s14 }
  0x30   : > { %s132_s24 = sshll.u32 %s125_s23, 4  ;;  %p598_p11 = pnand %p307_p9, %p56_p13  ;;  %s602_s24 = int_to_ptr.vmem [resolvable:$true] %s132_s24 }
  0x31   : > { %s371_s28 = scalar_lea.hbm %s596_s19, 128  ;;  %s376_s3 = scalar_lea.hbm %s693_s1, 256 }
  0x32   : > { %p372_p0 = scmp.ne.s32.totalorder %s596_s19, %s371_s28  ;;  %p373_p3 = pneg %p598_p11 }
  0x33   : > { %p377_p10 = scmp.lt.u32.totalorder %s596_s19, %s693_s1  ;;  %p378_p1 = scmp.lt.u32.totalorder %s376_s3, %s371_s28 }
  0x34   : > { %p374_p5 = pnand %p373_p3, %p372_p0  ;;  %p380_p4 = scmp.lt.u32.totalorder %s371_s28, %s596_s19 }
  0x35   : > { %p379_p2 = por %p378_p1, %p377_p10 }
  0x36   : > { %p375_p7 = pneg %p374_p5 }
  0x37   : > { %p381_p6 = por %p380_p4, %p379_p2 }
  0x39   : > { %p382_p9 = pnand %p381_p6, %p375_p7 }
  0x3b   : > { %385 = shalt.err (!%p382_p9)
}
  0x3c   : > { %s386_s6 = scalar_lea.vmem %s602_s24, 128  ;;  %s474_s14 = smov [#allocation5]  }
  0x3d   : > { %p387_p12 = scmp.ne.s32.totalorder %s602_s24, %s386_s6  ;;  %s391_s18 = sshll.u32 %s474_s14, 4  ;;  %s392_s18 = int_to_ptr.vmem [resolvable:$false] %s391_s18 }
  0x3e   : > { %s393_s21 = scalar_lea.vmem %s392_s18, 256  ;;  %p394_p5 = scmp.lt.s32.totalorder %s602_s24, %s392_s18 }
  0x3f   : > { %p389_p13 = pnand %p387_p12, %p373_p3  ;;  %p395_p10 = scmp.lt.s32.totalorder %s393_s21, %s386_s6 }
  0x41   : > { %p390_p0 = pneg %p389_p13  ;;  %p396_p1 = por %p395_p10, %p394_p5 }
  0x43   : > { %p397_p2 = pnand %p396_p1, %p390_p0 }
  0x45   : > { %400 = shalt.err (!%p397_p2)
}
  0x46   : > { %301 = dma.hbm_to_vmem [thread:$0]  (!%p598_p11), %s596_s19, 128, %s602_s24, %s122_s27  }
  0x47   : > { %p709_p7 = scmp.ne.s32.totalorder %s700_s17, 0 }
  0x48   : > { %p710_p3 = scmp.eq.s32.totalorder (!%p709_p7), %s512_s13, 0 }
  0x49   : > { %141 = sbr.rel (%p709_p7) target bundleno = 110 (0x6e), region = 28 }
  0x50   : > { %446 = dma.done.wait (%p710_p3), [#allocation3], 128   ;;  %p711_p4 = pmov %p710_p3 }
  0x51   : > { %s636_s22 = sand.u32 1, %s463_s10   ;;  %p712_p6 = scmp.ne.s32.totalorder %s698_s15, 0 }
  0x52   : > { %448 = vsyncadd (%p711_p4), [#allocation3], 4294967168  ;;  %s280_s25 = sshll.u32 %s636_s22, 3  ;;  %s148_s23 = scalar_lea.sflag [#allocation6], %s636_s22 }
  0x53   : > { %s151_s26 = scalar_lea.vmem [#allocation5], %s280_s25 }
  0x54   : > { %450 = dma.done.wait (%p712_p6), %s148_s23, 128  }
  0x55   : > { %452 = vsyncadd (%p712_p6), %s148_s23, 4294967168  ;;  %s171_s17 = scalar_lea.vmem [#allocation7], %s280_s25  ;;  %s283_s24 = sshll.u32 %s512_s13, 7  ;;  %v172_v0 = vld [vmem:[%s151_s26] sm:$0xff]  ;;  %v173_v1 = vld [vmem:[#allocation2] sm:$0xff] }
  0x56   : > { %s190_s19 = sshll.u32 %s171_s17, 4  ;;  %v174_v2 = vadd.f32 %v173_v1, %v172_v0  ;;  %s650_s29 = scalar_lea.hbm %s694_s2, %s283_s24  ;;  %s645_s19 = int_to_ptr.vmem [resolvable:$true] %s190_s19 }
  0x57   : > { %s177_s15 = scalar_lea.sflag [#allocation4], %s636_s22  ;;  %s401_s30 = scalar_lea.vmem %s645_s19, 128 }
  0x58   : > { %175 = vst [vmem:[%s171_s17] sm:$0xff] %v174_v2  ;;  %p402_p11 = scmp.ne.s32.totalorder %s645_s19, %s401_s30  ;;  %s475_s13 = smov [#allocation7]  }
  0x59   : > { %s405_s3 = sshll.u32 %s475_s13, 4  ;;  %s406_s3 = int_to_ptr.vmem [resolvable:$false] %s405_s3 }
  0x5a   : > { %p403_p9 = pnand %p402_p11, %p583_p8  ;;  %s407_s4 = scalar_lea.vmem %s406_s3, 256 }
  0x5b   : > { %p408_p13 = scmp.lt.s32.totalorder %s645_s19, %s406_s3  ;;  %p409_p0 = scmp.lt.s32.totalorder %s407_s4, %s401_s30 }
  0x5c   : > { %p404_p12 = pneg %p403_p9 }
  0x5d   : > { %p410_p5 = por %p409_p0, %p408_p13 }
  0x5f   : > { %p411_p10 = pnand %p410_p5, %p404_p12 }
  0x61   : > { %414 = shalt.err (!%p411_p10)
}
  0x62   : > { %s415_s5 = scalar_lea.hbm %s650_s29, 128  ;;  %s419_s18 = scalar_lea.hbm %s694_s2, 256 }
  0x63   : > { %p416_p1 = scmp.ne.s32.totalorder %s650_s29, %s415_s5  ;;  %p420_p3 = scmp.lt.u32.totalorder %s650_s29, %s694_s2 }
  0x64   : > { %p421_p4 = scmp.lt.u32.totalorder %s419_s18, %s415_s5  ;;  %p423_p11 = scmp.lt.u32.totalorder %s415_s5, %s650_s29 }
  0x65   : > { %p417_p2 = pnand %p416_p1, %p583_p8 }
  0x66   : > { %p422_p6 = por %p421_p4, %p420_p3 }
  0x67   : > { %p418_p7 = pneg %p417_p2 }
  0x68   : > { %p424_p9 = por %p423_p11, %p422_p6 }
  0x6a   : > { %p425_p12 = pnand %p424_p9, %p418_p7 }
  0x6c   : > { %428 = shalt.err (!%p425_p12)
}
  0x6d   : > { %292 = dma.vmem_to_hbm [thread:$0]  (%p583_p8), %s645_s19, 128, %s650_s29, %s177_s15  }
  0x6e PF: > { %s202_s25 = sand.u32 1, %s459_s9   ;;  %p713_p13 = scmp.ne.s32.totalorder %s699_s16, 0 }
  0x6f   : > { %p714_p0 = scmp.ge.s32.totalorder %s471_s12, 2  ;;  %s203_s23 = scalar_lea.sflag [#allocation4], %s202_s25 }
  0x71   : > { %p303_p5 = pnand %p714_p0, %p713_p13 }
  0x73   : > { %454 = dma.done.wait (!%p303_p5), %s203_s23, 128  }
  0x74   : > { %456 = vsyncadd (!%p303_p5), %s203_s23, 4294967168  ;;  %p16_p10 = scmp.ge.s32.totalorder %s539_s20, 4   ;;  %s715_s9 = smov %s463_s10 }
  0x75   : > { %s716_s10 = smov %s467_s11  ;;  %s717_s11 = smov %s575_s7 }
  0x76   : > { %s718_s12 = smov %s539_s20  ;;  %18 = sbr.rel (!%p16_p10) target bundleno = 6 (0x6), region = 78 }
  0x7d   :  { %208 = vsyncpa [#allocation3], 1 }
  0x7e   :  { %210 = vsyncpa [#allocation3 + $0x1], 1 }
  0x7f   :  { %211 = vsyncpa [#allocation6], 1 }
  0x80   :  { %213 = vsyncpa [#allocation6 + $0x1], 1 }
  0x81   :  { %214 = vsyncpa [#allocation4], 1 }
  0x82   :  { %216 = vsyncpa [#allocation4 + $0x1], 1 }

// kernel: bert_decoder_forward.13
= control target key start
LH: loop header
LB: loop body
LE: loop exit
PB: predicated region body
PF: predicated region fallthrough
CT: control target
= control target key end

     0   :  { %v153_v0 = vmov 0.0   ;;  %vm154_vm0 = vmmov 0   ;;  %vm46_vm1 = vcmask 261120   ;;  %s190_s1 = inlined_call_operand.vmem [shape: bf16[32,128], index: 1, kind: input, shape index: {}]   ;;  %s191_s0 = inlined_call_operand.vmem [shape: bf16[16,32], index: 0, kind: input, shape index: {}]   ;;  %s192_s2 = inlined_call_operand.vmem [shape: f32[1,128], index: 2, kind: input, shape index: {}]   ;;  %s193_s3 = inlined_call_operand.vmem [shape: bf16[16,128], index: 3, kind: output, shape index: {}]  }
   0x1   :  { %140 = vmatprep.subr.bf16.mxu0 %v153_v0  ;;  %v150_v1 = vld [vmem:[%s190_s1] sm:$0xff]   ;;  %144 = vmatprep.mubr.msk.bf16.mxu0 %vm154_vm0, %v153_v0  ;;  %v151_v2 = vld [vmem:[%s190_s1 + $0x8] sm:$0xff]  }
   0x2   :  { %141 = vmatpush3.bf16.msra.mxu0 %v150_v1  ;;  %v152_v3 = vld [vmem:[%s191_s0] sm:$0xff]  }
   0x3   :  { %142 = vmatprep.subr.bf16.mxu0 %v153_v0  ;;  %v127_v5 = vld [vmem:[%s192_s2] ss:$0 sm:$0xff] }
   0x6   :  { %143 = vmatpush3.bf16.msra.mxu0 %v151_v2 }
   0x9   :  { %145 = vmatmul.mubr.msk.bf16.vlgmr.msra.gmra.mrb[0].mxu0 %vm46_vm1, %v152_v3 }
  0xdc   :  { %v84_v4 = vpop.f32.mrb[0].mxu0 }
  0xdd   :  { %v146_v6 = vpop.f32.mrb[1].mxu0  ;;  %v107_v8 = vadd.f32 %v127_v5, %v84_v4 }
  0xde   :  { %v87_v7 = vpop.f32.mrb[2].mxu0 }
  0xdf   :  { %v108_v9 = vadd.f32 %v127_v5, %v87_v7  ;;  %v147_v10 = vpop.f32.mrb[3].mxu0 }
  0xe1   :  { %v135_v11 = vpack.c.bf16 %v108_v9, %v107_v8 }
  0xe3   :  { %136 = vst [vmem:[%s193_s3] sm:$0xff] %v135_v11  }

// kernel: bert_decoder_forward.8
= control target key start
LH: loop header
LB: loop body
LE: loop exit
PB: predicated region body
PF: predicated region fallthrough
CT: control target
= control target key end

     0   :  { %s1907_s29 = smov 0   ;;  %s1909_s30 = smov 0   ;;  %s2148_s0 = inlined_call_operand.vmem [shape: bf16[2,8,32], index: 0, kind: input, shape index: {}]   ;;  %s2149_s1 = inlined_call_operand.vmem [shape: bf16[2,8,32], index: 1, kind: input, shape index: {}]   ;;  %s2150_s2 = inlined_call_operand.vmem [shape: bf16[2,32,128], index: 2, kind: input, shape index: {}]   ;;  %s2151_s3 = inlined_call_operand.vmem [shape: f32[2,1,128], index: 3, kind: input, shape index: {}]   ;;  %s2152_s4 = inlined_call_operand.vmem [shape: bf16[2,32,128], index: 4, kind: input, shape index: {}]   ;;  %s2153_s5 = inlined_call_operand.vmem [shape: f32[2,1,128], index: 5, kind: input, shape index: {}]   ;;  %s2154_s6 = inlined_call_operand.vmem [shape: bf16[2,32,128], index: 6, kind: input, shape index: {}]   ;;  %s2155_s7 = inlined_call_operand.vmem [shape: f32[2,1,128], index: 7, kind: input, shape index: {}]   ;;  %s2156_s8 = inlined_call_operand.vmem [shape: bf16[2,128,32], index: 8, kind: input, shape index: {}]   ;;  %s2157_s9 = inlined_call_operand.vmem [shape: f32[1,32], index: 9, kind: input, shape index: {}]   ;;  %s2158_s10 = inlined_call_operand.vmem [shape: f32[1,32], index: 10, kind: input, shape index: {}]   ;;  %s2159_s11 = inlined_call_operand.vmem [shape: f32[1,32], index: 11, kind: input, shape index: {}]   ;;  %s2160_s12 = inlined_call_operand.vmem [shape: f32[2,1,8], index: 12, kind: input, shape index: {}]   ;;  %s2161_s13 = inlined_call_operand.vmem [shape: f32[2,8,1], index: 13, kind: input, shape index: {}]   ;;  %s2162_s14 = inlined_call_operand.vmem [shape: bf16[2,8,32], index: 14, kind: output, shape index: {}]  }
   0x1   :  { %s1911_s15 = smov 0  }
   0x2 LB: > { %s36_s16 = sadd.s32 1, %s1823_s30  ;;  %p1531_p0 = scmp.ge.s32.totalorder %s1827_s15, 1  ;;  %s1827_s15 = sphi %s1911_s15, %s24_s15   ;;  %s1823_s30 = sphi %s1909_s30, %s2164_s30   ;;  %s1819_s29 = sphi %s1907_s29, %s2163_s29  }
   0x3   : > { %p38_p1 = scmp.ge.s32.totalorder %s36_s16, 2  ;;  %p461_p2 = scmp.lt.s32.totalorder %s1827_s15, 3 }
   0x5   : > { %s2166_s16 = smov (%p38_p1, %s36_s16), 0  ;;  %p462_p3 = pnand %p1531_p0, %p461_p2 }
   0x6   : > { %v1767_v0 = vld [vmem:[%s2150_s2] sm:$0xff] (!%p462_p3)   ;;  %v1829_v1 = vmov (!%p462_p3), 0.0   ;;  %v1768_v2 = vld [vmem:[%s2150_s2 + $0x10] sm:$0xff] (!%p462_p3)   ;;  %v1769_v3 = vld [vmem:[%s2150_s2 + $0x8] sm:$0xff] (!%p462_p3)   ;;  %vm1830_vm0 = vmmov (!%p462_p3), 0   ;;  %p525_p4 = scmp.lt.s32.totalorder (!%p462_p3), %s1819_s29, 1  ;;  %v949_v59 = vlaneseq (!%p462_p3) }
   0x7   : > { %465 = sbr.rel (%p462_p3) target bundleno = 1534 (0x5fe), region = 76  ;;  %1627 = vmatprep.subr.bf16.mxu0 (!%p462_p3), %v1829_v1  ;;  %1635 = vmatprep.subr.bf16.mxu1 (!%p462_p3), %v1829_v1  ;;  %v1770_v4 = vld [vmem:[%s2150_s2 + $0x18] sm:$0xff] (!%p462_p3)   ;;  %vm590_vm1 = vcmask (!%p462_p3), 261120   ;;  %v1771_v5 = vld [vmem:[%s2152_s4] sm:$0xff] (!%p462_p3)   ;;  %v1772_v6 = vld [vmem:[%s2152_s4 + $0x10] sm:$0xff] (!%p462_p3)   ;;  %vm1064_vm2 = vcmask (!%p462_p3), 1043456  }
   0x8   : > { %1628 = vmatpush3.bf16.msra.mxu0 (!%p462_p3), %v1767_v0  ;;  %1631 = vmatprep.mubr.msk.bf16.mxu0 (!%p462_p3), %vm1830_vm0, %v1829_v1  ;;  %v1773_v8 = vld [vmem:[%s2152_s4 + $0x8] sm:$0xff] (!%p462_p3)   ;;  %v1774_v9 = vld [vmem:[%s2152_s4 + $0x18] sm:$0xff] (!%p462_p3)   ;;  %v1775_v11 = vld [vmem:[%s2154_s6] sm:$0xff] (!%p462_p3)   ;;  %v950_v61 = vshrl.u32 (!%p462_p3), %v949_v59, 7  ;;  %vm1034_vm4 = vcmask (!%p462_p3), 64512   ;;  %vm1415_vm5 = vcmask (!%p462_p3), 257024  }
   0x9   : > { %1636 = vmatpush3.bf16.msra.mxu1 (!%p462_p3), %v1768_v2  ;;  %1629 = vmatprep.subr.bf16.mxu0 (!%p462_p3), %v1829_v1  ;;  %v1776_v12 = vld [vmem:[%s2154_s6 + $0x10] sm:$0xff] (!%p462_p3)   ;;  %v1777_v13 = vld [vmem:[%s2154_s6 + $0x8] sm:$0xff] (!%p462_p3)   ;;  %v1778_v14 = vld [vmem:[%s2154_s6 + $0x18] sm:$0xff] (!%p462_p3)  }
   0xa   : > { %1637 = vmatprep.subr.bf16.mxu1 (!%p462_p3), %v1829_v1  ;;  %1639 = vmatprep.mubr.msk.bf16.mxu1 (!%p462_p3), %vm1830_vm0, %v1829_v1  ;;  %v1544_v23 = vld [vmem:[%s2153_s5] ss:$0 sm:$0xff] (!%p462_p3)  ;;  %v1545_v24 = vld [vmem:[%s2153_s5 + $0x1] ss:$0 sm:$0xff] (!%p462_p3)  ;;  %v951_v62 = vsub.s32 (!%p462_p3), 0, %v950_v61 }
   0xb   : > { %v1536_v32 = vld [vmem:[%s2151_s3] ss:$0 sm:$0xff] (!%p462_p3)  ;;  %v1537_v36 = vld [vmem:[%s2151_s3 + $0x1] ss:$0 sm:$0xff] (!%p462_p3) }
   0xc   : > { %1630 = vmatpush3.bf16.msra.mxu0 (!%p462_p3), %v1769_v3  ;;  %v1552_v43 = vld [vmem:[%s2155_s7] ss:$0 sm:$0xff] (!%p462_p3)  ;;  %v1553_v44 = vld [vmem:[%s2155_s7 + $0x1] ss:$0 sm:$0xff] (!%p462_p3) }
   0xd   : > { %1638 = vmatpush3.bf16.msra.mxu1 (!%p462_p3), %v1770_v4  ;;  %1643 = vmatprep.subr.bf16.mxu0 (!%p462_p3), %v1829_v1 }
   0xe   : > { %s2168_s29 = smov (!%p525_p4, %s1819_s29), 1  ;;  %1651 = vmatprep.subr.bf16.mxu1 %v1829_v1 }
   0xf   : > { %s1948_s25 = sshll.u32 %s2168_s29, 2  ;;  %s538_s17 = scalar_lea.vmem %s2160_s12, %s2168_s29 }
  0x10   : > { %s531_s18 = scalar_lea.vmem %s2148_s0, %s1948_s25  ;;  %s535_s28 = scalar_lea.vmem %s2149_s1, %s1948_s25  ;;  %v941_v60 = vld [vmem:[%s538_s17] sm:$0x1] }
  0x11   : > { %v1961_v7 = vld [vmem:[%s531_s18] sm:$0xf]  ;;  %vm942_vm3 = vcmp.gt.f32.partialorder %v941_v60, 0.5  ;;  %s1534_s19 = sshll.u32 %s2168_s29, 3  ;;  %s552_s17 = scalar_lea.vmem %s2162_s14, %s1948_s25 }
  0x12   : > { %1632 = vmatmul.mubr.msk.bf16.vlgmr.msra.gmra.mrb[0].mxu0 %vm590_vm1, %v1961_v7  ;;  %1640 = vmatmul.mubr.msk.bf16.vlgmr.msra.gmra.mrb[0].mxu1 %vm590_vm1, %v1961_v7  ;;  %v555_v10 = vld [vmem:[%s535_s28] sm:$0xf]  ;;  %v943_v63 = vsel %vm942_vm3, -1e+30, %v1829_v1  ;;  %s545_s22 = scalar_lea.vmem %s2161_s13, %s1534_s19 }
  0x13   : > { %1644 = vmatpush3.bf16.msra.mxu0 %v1771_v5  ;;  %1652 = vmatpush3.bf16.msra.mxu1 %v1772_v6  ;;  %v952_v0 = vrot.slane %v943_v63, %v951_v62 }
  0x14   : > { %1645 = vmatprep.subr.bf16.mxu0 %v1829_v1  ;;  %1653 = vmatprep.subr.bf16.mxu1 %v1829_v1 }
  0x15   : > { %1647 = vmatprep.mubr.msk.bf16.mxu0 %vm1830_vm0, %v1829_v1  ;;  %1655 = vmatprep.mubr.msk.bf16.mxu1 %vm1830_vm0, %v1829_v1 }
  0x17   : > { %1646 = vmatpush3.bf16.msra.mxu0 %v1773_v8  ;;  %1654 = vmatpush3.bf16.msra.mxu1 %v1774_v9 }
  0x18   : > { %1659 = vmatprep.subr.bf16.mxu0 %v1829_v1  ;;  %1667 = vmatprep.subr.bf16.mxu1 %v1829_v1 }
  0x1a   : > { %1648 = vmatmul.mubr.msk.bf16.vlgmr.msra.gmra.mrb[4].mxu0 %vm590_vm1, %v555_v10  ;;  %1656 = vmatmul.mubr.msk.bf16.vlgmr.msra.gmra.mrb[4].mxu1 %vm590_vm1, %v555_v10 }
  0x1b   : > { %1663 = vmatprep.mubr.msk.bf16.mxu0 %vm1830_vm0, %v1829_v1  ;;  %1671 = vmatprep.mubr.msk.bf16.mxu1 %vm1830_vm0, %v1829_v1 }
  0x1c   : > { %1660 = vmatpush3.bf16.msra.mxu0 %v1775_v11  ;;  %1668 = vmatpush3.bf16.msra.mxu1 %v1776_v12 }
  0x1d   : > { %1661 = vmatprep.subr.bf16.mxu0 %v1829_v1  ;;  %1669 = vmatprep.subr.bf16.mxu1 %v1829_v1 }
  0x20   : > { %1662 = vmatpush3.bf16.msra.mxu0 %v1777_v13  ;;  %1670 = vmatpush3.bf16.msra.mxu1 %v1778_v14 }
  0x21   : > { %1675 = vmatprep.subr.bf16.mxu0 %v1829_v1  ;;  %1681 = vmatprep.subr.bf16.mxu1 %v1829_v1 }
  0x23   : > { %1664 = vmatmul.mubr.msk.bf16.vlgmr.msra.gmra.mrb[8].mxu0 %vm590_vm1, %v555_v10  ;;  %1672 = vmatmul.mubr.msk.bf16.vlgmr.msra.gmra.mrb[8].mxu1 %vm590_vm1, %v555_v10 }
  0x24   : > { %1677 = vmatprep.mubr.msk.bf16.mxu0 %vm1830_vm0, %v1829_v1  ;;  %1683 = vmatprep.mubr.msk.bf16.mxu1 %vm1830_vm0, %v1829_v1 }
  0xe5   : > { %v628_v15 = vpop.f32.mrb[0].mxu0  ;;  %v680_v17 = vpop.f32.mrb[0].mxu1 }
  0xe6   : > { %v1633_v16 = vpop.f32.mrb[1].mxu0  ;;  %v1641_v19 = vpop.f32.mrb[1].mxu1  ;;  %v629_v39 = vadd.f32 %v1536_v32, %v628_v15  ;;  %v681_v40 = vadd.f32 %v1537_v36, %v680_v17  ;;  %v1782_v36 = vld [vmem:[%s2156_s8 + $0x10] sm:$0xff]  }
  0xe7   : > { %v631_v18 = vpop.f32.mrb[2].mxu0  ;;  %v683_v21 = vpop.f32.mrb[2].mxu1 }
  0xe8   : > { %v1634_v20 = vpop.f32.mrb[3].mxu0  ;;  %v1642_v22 = vpop.f32.mrb[3].mxu1  ;;  %v944_v41 = vpack.c.bf16 %v629_v39, %v629_v39  ;;  %v945_v42 = vpack.c.bf16 %v681_v40, %v681_v40  ;;  %v1785_v39 = vld [vmem:[%s2156_s8 + $0x50] sm:$0xff]   ;;  %v1786_v40 = vld [vmem:[%s2156_s8 + $0x20] sm:$0xff]  }
  0xed   : > { %v757_v25 = vpop.f32.mrb[4].mxu0  ;;  %v809_v27 = vpop.f32.mrb[4].mxu1 }
  0xee   : > { %v758_v26 = vadd.f32 %v1544_v23, %v757_v25  ;;  %v1649_v28 = vpop.f32.mrb[5].mxu0  ;;  %v810_v29 = vadd.f32 %v1545_v24, %v809_v27  ;;  %v1657_v31 = vpop.f32.mrb[5].mxu1 }
  0xef   : > { %v760_v30 = vpop.f32.mrb[6].mxu0  ;;  %v812_v35 = vpop.f32.mrb[6].mxu1 }
  0xf0   : > { %v946_v33 = vpack.c.bf16 %v758_v26, %v758_v26  ;;  %v1650_v34 = vpop.f32.mrb[7].mxu0  ;;  %v947_v37 = vpack.c.bf16 %v810_v29, %v810_v29  ;;  %v1658_v38 = vpop.f32.mrb[7].mxu1  ;;  %v1779_v29 = vld [vmem:[%s2156_s8] sm:$0xff]  }
  0xf1   : > { %v1781_v34 = vld [vmem:[%s2156_s8 + $0x40] sm:$0xff]   ;;  %v1784_v38 = vld [vmem:[%s2156_s8 + $0x18] sm:$0xff]  }
  0xf2   : > { %1676 = vmatpush3.bf16.xpose.msra.mxu0 %v946_v33  ;;  %1682 = vmatpush3.bf16.xpose.msra.mxu1 %v947_v37  ;;  %v1780_v33 = vld [vmem:[%s2156_s8 + $0x8] sm:$0xff]  }
  0xf3   : > { %1687 = vmatprep.subr.bf16.mxu0 %v1829_v1  ;;  %1693 = vmatprep.subr.bf16.mxu1 %v1829_v1  ;;  %v1783_v37 = vld [vmem:[%s2156_s8 + $0x48] sm:$0xff]  }
  0xf6   : > { %v883_v45 = vpop.f32.mrb[8].mxu0  ;;  %v935_v46 = vpop.f32.mrb[8].mxu1 }
  0xf7   : > { %v884_v47 = vadd.f32 %v1552_v43, %v883_v45  ;;  %v1665_v48 = vpop.f32.mrb[9].mxu0  ;;  %v936_v49 = vadd.f32 %v1553_v44, %v935_v46  ;;  %v1673_v50 = vpop.f32.mrb[9].mxu1  ;;  %v1789_v43 = vld [vmem:[%s2156_s8 + $0x60] sm:$0xff]   ;;  %v1790_v44 = vld [vmem:[%s2156_s8 + $0x30] sm:$0xff]   ;;  %v1791_v45 = vld [vmem:[%s2156_s8 + $0x68] sm:$0xff]  }
  0xf8   : > { %v886_v51 = vpop.f32.mrb[10].mxu0  ;;  %v938_v52 = vpop.f32.mrb[10].mxu1  ;;  %v1792_v46 = vld [vmem:[%s2156_s8 + $0x38] sm:$0xff]  }
  0xf9   : > { %1678 = vmatmul.mubr.bf16.vlgmr.msra.gmra.mrb[12].mxu0 %v944_v41  ;;  %1684 = vmatmul.mubr.bf16.vlgmr.msra.gmra.mrb[12].mxu1 %v945_v42  ;;  %v1059_v53 = vpack.c.bf16 %v884_v47, %v884_v47  ;;  %v1666_v54 = vpop.f32.mrb[11].mxu0  ;;  %v1060_v55 = vpack.c.bf16 %v936_v49, %v936_v49  ;;  %v1674_v56 = vpop.f32.mrb[11].mxu1  ;;  %v1787_v41 = vld [vmem:[%s2156_s8 + $0x58] sm:$0xff]   ;;  %v1788_v42 = vld [vmem:[%s2156_s8 + $0x28] sm:$0xff]   ;;  %v1793_v47 = vld [vmem:[%s2156_s8 + $0x70] sm:$0xff]  }
  0xfa   : > { %1689 = vmatprep.mubr.msk.bf16.mxu0 %vm1830_vm0, %v1829_v1  ;;  %1695 = vmatprep.mubr.msk.bf16.mxu1 %vm1830_vm0, %v1829_v1  ;;  %v1794_v48 = vld [vmem:[%s2156_s8 + $0x78] sm:$0xff]  }
  0xfb   : > { %v1066_v57 = vsel %vm1064_vm2, %v1059_v53, 0  ;;  %v1112_v58 = vsel %vm1064_vm2, %v1060_v55, 0 }
  0xfc   : > { %1688 = vmatpush3.bf16.msra.mxu0 %v1066_v57  ;;  %1694 = vmatpush3.bf16.msra.mxu1 %v1112_v58 }
  0xfd   : > { %1699 = vmatprep.subr.bf16.mxu0 %v1829_v1  ;;  %1719 = vmatprep.subr.bf16.mxu1 %v1829_v1 }
 0x1cc   : > { %v988_v2 = vpop.f32.mrb[12].mxu0  ;;  %v1028_v4 = vpop.f32.mrb[12].mxu1 }
 0x1cd   : > { %v989_v3 = vadd.f32 %v988_v2, %v952_v0  ;;  %v1679_v5 = vpop.f32.mrb[13].mxu0  ;;  %v1685_v6 = vpop.f32.mrb[13].mxu1  ;;  %v1029_v9 = vadd.f32 %v1028_v4, %v952_v0  ;;  %v1578_v2 = vld [vmem:[%s2157_s9] ss:$0 sm:$0xff] }
 0x1ce   : > { %v991_v8 = vpop.f32.mrb[14].mxu0  ;;  %v1031_v10 = vpop.f32.mrb[14].mxu1  ;;  %v1375_v6 = vunpack.c.l.bf16 %v1961_v7 }
 0x1cf   : > { %v1680_v11 = vpop.f32.mrb[15].mxu0  ;;  %v1035_v12 = vsel %vm1034_vm4, %v989_v3, -inf  ;;  %v1686_v13 = vpop.f32.mrb[15].mxu1  ;;  %v1038_v14 = vsel %vm1034_vm4, %v1029_v9, -inf }
 0x1d0   : > { %1036 = vmax.xlane.f32.xlu0 %v1035_v12  ;;  %v1831_v12 = vmov 0   ;;  %v1407_v13 = vld [vmem:[%s545_s22] sm:$0xff] }
 0x1d1   : > { %1766 = vset.pattern.permute.xlu0 %v1831_v12 }
 0x1d4   : > { %1039 = vmax.xlane.f32.xlu0 %v1038_v14 }
 0x25d   : > { %v1037_v15 = vpop.xlane.xlu0 %1036 }
 0x25e   : > { %v1041_v16 = vsub.f32 %v989_v3, %v1037_v15 }
 0x260   : > { %v1043_v17 = vmul.f32 1.442695, %v1041_v16 }
 0x261   : > { %v1040_v18 = vpop.xlane.xlu0 %1039 }
 0x262   : > { %1795 = vpow2.f32 %v1043_v17  ;;  %v1042_v19 = vsub.f32 %v1029_v9, %v1040_v18 }
 0x264   : > { %v1045_v20 = vmul.f32 1.442695, %v1042_v19 }
 0x266   : > { %1797 = vpow2.f32 %v1045_v20 }
 0x26c   : > { %v1796_v21 = vpop.eup %1795 }
 0x26d   : > { %v1047_v22 = vsel %vm1034_vm4, %v1796_v21, 0.0 }
 0x26e   : > { %1048 = vadd.xlane.f32.xlu1 %v1047_v22  ;;  %v1579_v22 = vld [vmem:[%s2158_s10] ss:$0 sm:$0xff] }
 0x270   : > { %v1798_v23 = vpop.eup %1797 }
 0x271   : > { %v1050_v24 = vsel %vm1034_vm4, %v1798_v23, 0.0 }
 0x272   : > { %1051 = vadd.xlane.f32.xlu1 %v1050_v24  ;;  %v1580_v24 = vld [vmem:[%s2159_s11] ss:$0 sm:$0xff] }
 0x2fb   : > { %v1049_v25 = vpop.xlane.xlu1 %1048 }
 0x2fc   : > { %1799 = vrcp.f32 %v1049_v25 }
 0x2ff   : > { %v1052_v26 = vpop.xlane.xlu1 %1051 }
 0x300   : > { %1801 = vrcp.f32 %v1052_v26 }
 0x306   : > { %v1800_v27 = vpop.eup %1799 }
 0x307   : > { %v1055_v28 = vmul.f32 %v1800_v27, %v1796_v21 }
 0x309   : > { %v1057_v30 = vpack.c.bf16 %v1055_v28, %v1055_v28 }
 0x30a   : > { %v1802_v31 = vpop.eup %1801 }
 0x30b   : > { %v1056_v32 = vmul.f32 %v1802_v31, %v1798_v23  ;;  %1690 = vmatmul.mubr.msk.bf16.vlgmr.msra.gmra.mrb[16].mxu0 %vm1034_vm4, %v1057_v30 }
 0x30c   : > { %1700 = vmatpush3.bf16.msra.mxu0 %v1779_v29  ;;  %1715 = vmatprep.mubr.msk.bf16.mxu0 %vm1830_vm0, %v1829_v1 }
 0x30d   : > { %v1058_v35 = vpack.c.bf16 %v1056_v32, %v1056_v32  ;;  %1701 = vmatprep.subr.bf16.mxu0 %v1829_v1 }
 0x30f   : > { %1696 = vmatmul.mubr.msk.bf16.vlgmr.msra.gmra.mrb[16].mxu1 %vm1034_vm4, %v1058_v35 }
 0x310   : > { %1702 = vmatpush3.bf16.msra.mxu0 %v1780_v33  ;;  %1720 = vmatpush3.bf16.msra.mxu1 %v1781_v34 }
 0x311   : > { %1703 = vmatprep.subr.bf16.mxu0 %v1829_v1  ;;  %1721 = vmatprep.subr.bf16.mxu1 %v1829_v1 }
 0x312   : > { %1735 = vmatprep.mubr.msk.bf16.mxu1 %vm1830_vm0, %v1829_v1 }
 0x314   : > { %1704 = vmatpush3.bf16.msra.mxu0 %v1782_v36  ;;  %1722 = vmatpush3.bf16.msra.mxu1 %v1783_v37 }
 0x315   : > { %1705 = vmatprep.subr.bf16.mxu0 %v1829_v1  ;;  %1723 = vmatprep.subr.bf16.mxu1 %v1829_v1 }
 0x318   : > { %1706 = vmatpush3.bf16.msra.mxu0 %v1784_v38  ;;  %1724 = vmatpush3.bf16.msra.mxu1 %v1785_v39 }
 0x319   : > { %1707 = vmatprep.subr.bf16.mxu0 %v1829_v1  ;;  %1725 = vmatprep.subr.bf16.mxu1 %v1829_v1 }
 0x31c   : > { %1708 = vmatpush3.bf16.msra.mxu0 %v1786_v40  ;;  %1726 = vmatpush3.bf16.msra.mxu1 %v1787_v41 }
 0x31d   : > { %1709 = vmatprep.subr.bf16.mxu0 %v1829_v1  ;;  %1727 = vmatprep.subr.bf16.mxu1 %v1829_v1 }
 0x320   : > { %1710 = vmatpush3.bf16.msra.mxu0 %v1788_v42  ;;  %1728 = vmatpush3.bf16.msra.mxu1 %v1789_v43 }
 0x321   : > { %1711 = vmatprep.subr.bf16.mxu0 %v1829_v1  ;;  %1729 = vmatprep.subr.bf16.mxu1 %v1829_v1 }
 0x324   : > { %1712 = vmatpush3.bf16.msra.mxu0 %v1790_v44  ;;  %1730 = vmatpush3.bf16.msra.mxu1 %v1791_v45 }
 0x325   : > { %1713 = vmatprep.subr.bf16.mxu0 %v1829_v1  ;;  %1731 = vmatprep.subr.bf16.mxu1 %v1829_v1 }
 0x328   : > { %1714 = vmatpush3.bf16.msra.mxu0 %v1792_v46  ;;  %1732 = vmatpush3.bf16.msra.mxu1 %v1793_v47 }
 0x329   : > { %1733 = vmatprep.subr.bf16.mxu1 %v1829_v1 }
 0x32c   : > { %1734 = vmatpush3.bf16.msra.mxu1 %v1794_v48 }
 0x3de   : > { %v1102_v49 = vpop.f32.mrb[16].mxu0 }
 0x3df   : > { %v1154_v50 = vpack.c.bf16 %v1102_v49, %v1102_v49  ;;  %v1691_v51 = vpop.f32.mrb[17].mxu0 }
 0x3e0   : > { %v1105_v52 = vpop.f32.mrb[18].mxu0 }
 0x3e1   : > { %v1692_v53 = vpop.f32.mrb[19].mxu0  ;;  %1716 = vmatmul.mubr.bf16.vlgmr.msra.gmra.mrb[20].mxu0 %v1154_v50 }
 0x3e2   : > { %v1148_v54 = vpop.f32.mrb[16].mxu1 }
 0x3e3   : > { %v1155_v55 = vpack.c.bf16 %v1148_v54, %v1148_v54  ;;  %v1697_v56 = vpop.f32.mrb[17].mxu1 }
 0x3e4   : > { %v1151_v57 = vpop.f32.mrb[18].mxu1 }
 0x3e5   : > { %v1698_v58 = vpop.f32.mrb[19].mxu1  ;;  %1736 = vmatmul.mubr.bf16.vlgmr.msra.gmra.mrb[20].mxu1 %v1155_v55 }
 0x4b4   : > { %v1270_v59 = vpop.f32.mrb[20].mxu0 }
 0x4b5   : > { %v1717_v60 = vpop.f32.mrb[21].mxu0  ;;  %v1364_v63 = vsel %vm590_vm1, %v1270_v59, 0.0 }
 0x4b6   : > { %v1273_v1 = vpop.f32.mrb[22].mxu0 }
 0x4b7   : > { %v1718_v61 = vpop.f32.mrb[23].mxu0 }
 0x4b8   : > { %v1358_v62 = vpop.f32.mrb[20].mxu1 }
 0x4b9   : > { %v1365_v0 = vsel %vm590_vm1, %v1358_v62, 0.0  ;;  %v1737_v3 = vpop.f32.mrb[21].mxu1 }
 0x4ba   : > { %v1366_v4 = vadd.f32 %v1365_v0, %v1364_v63  ;;  %v1361_v5 = vpop.f32.mrb[22].mxu1 }
 0x4bb   : > { %v1738_v8 = vpop.f32.mrb[23].mxu1 }
 0x4bc   : > { %v1374_v9 = vadd.f32 %v1578_v2, %v1366_v4 }
 0x4be   : > { %v1376_v10 = vadd.f32 %v1375_v6, %v1374_v9 }
 0x4c0   : > { %v1379_v11 = vsel %vm590_vm1, %v1376_v10, 0.0 }
 0x4c1   : > { %1380 = vadd.xlane.f32.xlu0 %v1379_v11 }
 0x4d7   : > { %1410 = vperm.xlu0 %1766, %v1407_v13  }
 0x54e   : > { %v1381_v14 = vpop.xlane.xlu0 %1380 }
 0x54f   : > { %v1383_v15 = vmul.f32 0.03125, %v1381_v14 }
 0x551   : > { %v1384_v16 = vsub.f32 %v1376_v10, %v1383_v15 }
 0x553   : > { %v1385_v7 = vmul.f32 %v1384_v16, %v1384_v16 }
 0x555   : > { %v1386_v17 = vsel %vm590_vm1, %v1385_v7, 0.0 }
 0x556   : > { %1387 = vadd.xlane.f32.xlu1 %v1386_v17  ;;  %v1411_v26 = vpop.permute.xlu0 %1410 }
 0x5e3   : > { %v1388_v18 = vpop.xlane.xlu1 %1387 }
 0x5e4   : > { %v1389_v19 = vmul.f32 0.03125, %v1388_v18 }
 0x5e6   : > { %v1390_v20 = vadd.f32 1e-05, %v1389_v19 }
 0x5e8   : > { %1803 = vrsqrt.f32 %v1390_v20 }
 0x5f2   : > { %v1804_v21 = vpop.eup %1803 }
 0x5f3   : > { %v1392_v23 = vmul.f32 %v1804_v21, %v1384_v16 }
 0x5f5   : > { %v1399_v25 = vmul.f32 %v1579_v22, %v1392_v23 }
 0x5f7   : > { %v1406_v27 = vadd.f32 %v1580_v24, %v1399_v25 }
 0x5f9   : > { %v1413_v28 = vmul.f32 %v1411_v26, %v1406_v27 }
 0x5fb   : > { %v1414_v29 = vpack.c.bf16 %v1413_v28, %v1413_v28 }
 0x5fd   : > { %1416 = vst.msk [vmem:[%s552_s17] sm:$0xf] %vm1415_vm5, %v1414_v29 }
 0x5fe PF: > { %s24_s15 = sadd.s32 1, %s1827_s15   ;;  %s2163_s29 = smov %s1823_s30 }
 0x5ff   : > { %p21_p5 = scmp.ge.s32.totalorder %s24_s15, 4   ;;  %s2164_s30 = smov %s2166_s16 }
 0x601   :  { %23 = sbr.rel (!%p21_p5) target bundleno = 2 (0x2), region = 115 }

// kernel: bert_decoder_forward.9
= control target key start
LH: loop header
LB: loop body
LE: loop exit
PB: predicated region body
PF: predicated region fallthrough
CT: control target
= control target key end

     0   :  { %v332_v0 = vmov 0.0   ;;  %vm333_vm0 = vmmov 0   ;;  %vm60_vm1 = vcmask 261120   ;;  %vm147_vm2 = vcmask 523264   ;;  %s430_s1 = inlined_call_operand.vmem [shape: bf16[32,64], index: 1, kind: input, shape index: {}]   ;;  %s431_s0 = inlined_call_operand.vmem [shape: bf16[16,32], index: 0, kind: input, shape index: {}]   ;;  %s432_s3 = inlined_call_operand.vmem [shape: bf16[64,32], index: 3, kind: input, shape index: {}]   ;;  %s433_s2 = inlined_call_operand.vmem [shape: f32[1,64], index: 2, kind: input, shape index: {}]   ;;  %s434_s4 = inlined_call_operand.vmem [shape: f32[1,32], index: 4, kind: input, shape index: {}]   ;;  %s435_s7 = inlined_call_operand.vmem [shape: f32[16,1], index: 7, kind: input, shape index: {}]   ;;  %s436_s5 = inlined_call_operand.vmem [shape: f32[1,32], index: 5, kind: input, shape index: {}]   ;;  %s437_s6 = inlined_call_operand.vmem [shape: f32[1,32], index: 6, kind: input, shape index: {}]   ;;  %s438_s8 = inlined_call_operand.vmem [shape: bf16[16,32], index: 8, kind: output, shape index: {}]  }
   0x1   :  { %295 = vmatprep.subr.bf16.mxu0 %v332_v0  ;;  %v320_v1 = vld [vmem:[%s430_s1] sm:$0xff]   ;;  %299 = vmatprep.mubr.msk.bf16.mxu0 %vm333_vm0, %v332_v0  ;;  %v321_v2 = vld [vmem:[%s430_s1 + $0x8] sm:$0xff]   ;;  %v325_v6 = vld [vmem:[%s432_s3 + $0x10] sm:$0xff]   ;;  %v334_v31 = vmov 0   ;;  %vm263_vm3 = vcmask 257024  }
   0x2   :  { %303 = vmatprep.subr.bf16.mxu1 %v332_v0  ;;  %311 = vmatprep.mubr.msk.bf16.mxu1 %vm333_vm0, %v332_v0  ;;  %v30_v3 = vld [vmem:[%s431_s0] sm:$0xff]   ;;  %v324_v5 = vld [vmem:[%s432_s3 + $0x8] sm:$0xff]   ;;  %v326_v7 = vld [vmem:[%s432_s3 + $0x18] sm:$0xff]  }
   0x3   :  { %296 = vmatpush3.bf16.msra.mxu0 %v320_v1  ;;  %v323_v4 = vld [vmem:[%s432_s3] sm:$0xff]   ;;  %v192_v19 = vunpack.c.l.bf16 %v30_v3  ;;  %v193_v23 = vunpack.c.h.bf16 %v30_v3  ;;  %318 = vset.pattern.permute.xlu0 %v334_v31  ;;  %v242_v43 = vld [vmem:[%s435_s7 + $0x8] sm:$0xff] }
   0x4   :  { %297 = vmatprep.subr.bf16.mxu0 %v332_v0  ;;  %304 = vmatpush3.bf16.msra.mxu1 %v323_v4  ;;  %v270_v8 = vld [vmem:[%s433_s2] ss:$0 sm:$0xff] }
   0x5   :  { %305 = vmatprep.subr.bf16.mxu1 %v332_v0  ;;  %v275_v18 = vld [vmem:[%s434_s4] ss:$0 sm:$0xff]  ;;  %319 = vset.pattern.permute.xlu1 %v334_v31 }
   0x6   :  { %v241_v32 = vld [vmem:[%s435_s7] sm:$0xff] }
   0x7   :  { %298 = vmatpush3.bf16.msra.mxu0 %v321_v2  ;;  %v281_v51 = vld [vmem:[%s436_s5] ss:$0 sm:$0xff] }
   0x8   :  { %306 = vmatpush3.bf16.msra.mxu1 %v324_v5  ;;  %v282_v53 = vld [vmem:[%s437_s6] ss:$0 sm:$0xff] }
   0x9   :  { %307 = vmatprep.subr.bf16.mxu1 %v332_v0 }
   0xa   :  { %300 = vmatmul.mubr.msk.bf16.vlgmr.msra.gmra.mrb[0].mxu0 %vm60_vm1, %v30_v3 }
   0xc   :  { %308 = vmatpush3.bf16.msra.mxu1 %v325_v6 }
   0xd   :  { %309 = vmatprep.subr.bf16.mxu1 %v332_v0 }
  0x10   :  { %310 = vmatpush3.bf16.msra.mxu1 %v326_v7 }
  0xdd   :  { %v98_v9 = vpop.f32.mrb[0].mxu0 }
  0xde   :  { %v99_v10 = vadd.f32 %v270_v8, %v98_v9  ;;  %v301_v11 = vpop.f32.mrb[1].mxu0 }
  0xdf   :  { %v101_v12 = vpop.f32.mrb[2].mxu0 }
  0xe0   :  { %v102_v13 = vadd.f32 %v270_v8, %v101_v12  ;;  %v302_v14 = vpop.f32.mrb[3].mxu0  ;;  %v105_v15 = vmax.f32 %v99_v10, 0.0 }
  0xe2   :  { %v106_v16 = vmax.f32 %v102_v13, 0.0 }
  0xe4   :  { %v107_v17 = vpack.c.bf16 %v106_v16, %v105_v15 }
  0xe6   :  { %312 = vmatmul.mubr.msk.bf16.vlgmr.msra.gmra.mrb[0].mxu1 %vm147_vm2, %v107_v17 }
 0x1b9   :  { %v185_v20 = vpop.f32.mrb[0].mxu1 }
 0x1ba   :  { %v186_v21 = vadd.f32 %v275_v18, %v185_v20  ;;  %v313_v22 = vpop.f32.mrb[1].mxu1 }
 0x1bb   :  { %v188_v24 = vpop.f32.mrb[2].mxu1 }
 0x1bc   :  { %v189_v25 = vadd.f32 %v275_v18, %v188_v24  ;;  %v314_v26 = vpop.f32.mrb[3].mxu1  ;;  %v194_v27 = vadd.f32 %v192_v19, %v186_v21 }
 0x1be   :  { %v198_v28 = vsel %vm60_vm1, %v194_v27, 0.0  ;;  %v195_v29 = vadd.f32 %v193_v23, %v189_v25 }
 0x1bf   :  { %199 = vadd.xlane.f32.xlu0 %v198_v28 }
 0x1c0   :  { %v201_v30 = vsel %vm60_vm1, %v195_v29, 0.0 }
 0x1c3   :  { %202 = vadd.xlane.f32.xlu0 %v201_v30 }
 0x1d9   :  { %245 = vperm.xlu0 %318, %v241_v32  }
 0x24c   :  { %v200_v33 = vpop.xlane.xlu0 %199 }
 0x24d   :  { %v205_v34 = vmul.f32 0.03125, %v200_v33 }
 0x24f   :  { %v207_v35 = vsub.f32 %v194_v27, %v205_v34 }
 0x250   :  { %v203_v36 = vpop.xlane.xlu0 %202 }
 0x251   :  { %v206_v37 = vmul.f32 0.03125, %v203_v36  ;;  %v209_v38 = vmul.f32 %v207_v35, %v207_v35 }
 0x253   :  { %v208_v39 = vsub.f32 %v195_v29, %v206_v37  ;;  %v211_v40 = vsel %vm60_vm1, %v209_v38, 0.0 }
 0x254   :  { %212 = vadd.xlane.f32.xlu1 %v211_v40 }
 0x255   :  { %v210_v41 = vmul.f32 %v208_v39, %v208_v39 }
 0x257   :  { %v214_v42 = vsel %vm60_vm1, %v210_v41, 0.0 }
 0x258   :  { %215 = vadd.xlane.f32.xlu1 %v214_v42  ;;  %v246_v56 = vpop.permute.xlu0 %245 }
 0x269   :  { %250 = vperm.xlu1 %319, %v242_v43  }
 0x2e1   :  { %v213_v44 = vpop.xlane.xlu1 %212 }
 0x2e2   :  { %v217_v45 = vmul.f32 0.03125, %v213_v44 }
 0x2e4   :  { %v219_v46 = vadd.f32 1e-05, %v217_v45 }
 0x2e5   :  { %v216_v47 = vpop.xlane.xlu1 %215 }
 0x2e6   :  { %328 = vrsqrt.f32 %v219_v46  ;;  %v218_v48 = vmul.f32 0.03125, %v216_v47 }
 0x2e8   :  { %v220_v49 = vadd.f32 1e-05, %v218_v48 }
 0x2e9   :  { %v251_v61 = vpop.permute.xlu1 %250 }
 0x2ea   :  { %330 = vrsqrt.f32 %v220_v49 }
 0x2f0   :  { %v329_v50 = vpop.eup %328 }
 0x2f1   :  { %v223_v52 = vmul.f32 %v329_v50, %v207_v35 }
 0x2f3   :  { %v231_v54 = vmul.f32 %v281_v51, %v223_v52 }
 0x2f4   :  { %v331_v55 = vpop.eup %330 }
 0x2f5   :  { %v239_v57 = vadd.f32 %v282_v53, %v231_v54  ;;  %v224_v58 = vmul.f32 %v331_v55, %v208_v39 }
 0x2f7   :  { %v253_v59 = vmul.f32 %v246_v56, %v239_v57  ;;  %v232_v60 = vmul.f32 %v281_v51, %v224_v58 }
 0x2f9   :  { %v285_v62 = vpack.c.bf16 %v253_v59, %v253_v59  ;;  %v240_v63 = vadd.f32 %v282_v53, %v232_v60 }
 0x2fb   :  { %264 = vst.msk [vmem:[%s438_s8] sm:$0xf] %vm263_vm3, %v285_v62  ;;  %v254_v0 = vmul.f32 %v251_v61, %v240_v63 }
 0x2fd   :  { %v286_v1 = vpack.c.bf16 %v254_v0, %v254_v0 }
 0x2ff   :  { %265 = vst.msk [vmem:[%s438_s8 + $0x4] sm:$0xf] %vm263_vm3, %v286_v1 }

// kernel: bert_decoder_forward.7
= control target key start
LH: loop header
LB: loop body
LE: loop exit
PB: predicated region body
PF: predicated region fallthrough
CT: control target
= control target key end

     0   :  { %s1916_s29 = smov 0   ;;  %s1918_s30 = smov 0   ;;  %s2157_s0 = inlined_call_operand.vmem [shape: bf16[2,8,32], index: 0, kind: input, shape index: {}, may-alias: {0,1}]   ;;  %s2158_s1 = inlined_call_operand.vmem [shape: bf16[2,8,32], index: 1, kind: input, shape index: {}, may-alias: {0,1}]   ;;  %s2159_s2 = inlined_call_operand.vmem [shape: bf16[2,32,128], index: 2, kind: input, shape index: {}]   ;;  %s2160_s3 = inlined_call_operand.vmem [shape: f32[2,1,128], index: 3, kind: input, shape index: {}]   ;;  %s2161_s4 = inlined_call_operand.vmem [shape: bf16[2,32,128], index: 4, kind: input, shape index: {}]   ;;  %s2162_s5 = inlined_call_operand.vmem [shape: f32[2,1,128], index: 5, kind: input, shape index: {}]   ;;  %s2163_s6 = inlined_call_operand.vmem [shape: bf16[2,32,128], index: 6, kind: input, shape index: {}]   ;;  %s2164_s7 = inlined_call_operand.vmem [shape: f32[2,1,128], index: 7, kind: input, shape index: {}]   ;;  %s2165_s8 = inlined_call_operand.vmem [shape: bf16[2,128,32], index: 8, kind: input, shape index: {}]   ;;  %s2166_s9 = inlined_call_operand.vmem [shape: f32[1,32], index: 9, kind: input, shape index: {}]   ;;  %s2167_s10 = inlined_call_operand.vmem [shape: f32[1,32], index: 10, kind: input, shape index: {}]   ;;  %s2168_s11 = inlined_call_operand.vmem [shape: f32[1,32], index: 11, kind: input, shape index: {}]   ;;  %s2169_s12 = inlined_call_operand.vmem [shape: f32[2,1,8], index: 12, kind: input, shape index: {}]   ;;  %s2170_s13 = inlined_call_operand.vmem [shape: f32[2,8,1], index: 13, kind: input, shape index: {}]   ;;  %s2171_s14 = inlined_call_operand.vmem [shape: bf16[2,8,32], index: 14, kind: output, shape index: {}]  }
   0x1   :  { %s1920_s15 = smov 0  }
   0x2 LB: > { %s36_s16 = sadd.s32 1, %s1832_s30  ;;  %p1540_p0 = scmp.ge.s32.totalorder %s1836_s15, 1  ;;  %s1836_s15 = sphi %s1920_s15, %s24_s15   ;;  %s1832_s30 = sphi %s1918_s30, %s2173_s30   ;;  %s1828_s29 = sphi %s1916_s29, %s2172_s29  }
   0x3   : > { %p38_p1 = scmp.ge.s32.totalorder %s36_s16, 2  ;;  %p461_p2 = scmp.lt.s32.totalorder %s1836_s15, 3 }
   0x5   : > { %s2175_s16 = smov (%p38_p1, %s36_s16), 0  ;;  %p462_p3 = pnand %p1540_p0, %p461_p2 }
   0x6   : > { %v1776_v0 = vld [vmem:[%s2159_s2] sm:$0xff] (!%p462_p3)   ;;  %v1838_v1 = vmov (!%p462_p3), 0.0   ;;  %v1777_v2 = vld [vmem:[%s2159_s2 + $0x10] sm:$0xff] (!%p462_p3)   ;;  %v1778_v3 = vld [vmem:[%s2159_s2 + $0x8] sm:$0xff] (!%p462_p3)   ;;  %vm1839_vm0 = vmmov (!%p462_p3), 0   ;;  %p525_p4 = scmp.lt.s32.totalorder (!%p462_p3), %s1828_s29, 1  ;;  %v945_v59 = vlaneseq (!%p462_p3) }
   0x7   : > { %465 = sbr.rel (%p462_p3) target bundleno = 1534 (0x5fe), region = 76  ;;  %1636 = vmatprep.subr.bf16.mxu0 (!%p462_p3), %v1838_v1  ;;  %1644 = vmatprep.subr.bf16.mxu1 (!%p462_p3), %v1838_v1  ;;  %v1779_v4 = vld [vmem:[%s2159_s2 + $0x18] sm:$0xff] (!%p462_p3)   ;;  %vm590_vm1 = vcmask (!%p462_p3), 261120   ;;  %v1780_v5 = vld [vmem:[%s2161_s4] sm:$0xff] (!%p462_p3)   ;;  %v1781_v6 = vld [vmem:[%s2161_s4 + $0x10] sm:$0xff] (!%p462_p3)   ;;  %vm1073_vm2 = vcmask (!%p462_p3), 1043456  }
   0x8   : > { %1637 = vmatpush3.bf16.msra.mxu0 (!%p462_p3), %v1776_v0  ;;  %1640 = vmatprep.mubr.msk.bf16.mxu0 (!%p462_p3), %vm1839_vm0, %v1838_v1  ;;  %v1782_v8 = vld [vmem:[%s2161_s4 + $0x8] sm:$0xff] (!%p462_p3)   ;;  %v1783_v9 = vld [vmem:[%s2161_s4 + $0x18] sm:$0xff] (!%p462_p3)   ;;  %v1784_v11 = vld [vmem:[%s2163_s6] sm:$0xff] (!%p462_p3)   ;;  %v946_v61 = vshrl.u32 (!%p462_p3), %v945_v59, 7  ;;  %v956_v0 = vand.u32 (!%p462_p3), 127, %v945_v59  ;;  %vm1043_vm5 = vcmask (!%p462_p3), 64512  }
   0x9   : > { %1645 = vmatpush3.bf16.msra.mxu1 (!%p462_p3), %v1777_v2  ;;  %1638 = vmatprep.subr.bf16.mxu0 (!%p462_p3), %v1838_v1  ;;  %v1785_v12 = vld [vmem:[%s2163_s6 + $0x10] sm:$0xff] (!%p462_p3)   ;;  %v1786_v13 = vld [vmem:[%s2163_s6 + $0x8] sm:$0xff] (!%p462_p3)   ;;  %v1787_v14 = vld [vmem:[%s2163_s6 + $0x18] sm:$0xff] (!%p462_p3)   ;;  %vm1424_vm6 = vcmask (!%p462_p3), 257024  }
   0xa   : > { %1646 = vmatprep.subr.bf16.mxu1 (!%p462_p3), %v1838_v1  ;;  %1648 = vmatprep.mubr.msk.bf16.mxu1 (!%p462_p3), %vm1839_vm0, %v1838_v1  ;;  %v1553_v23 = vld [vmem:[%s2162_s5] ss:$0 sm:$0xff] (!%p462_p3)  ;;  %v1554_v24 = vld [vmem:[%s2162_s5 + $0x1] ss:$0 sm:$0xff] (!%p462_p3)  ;;  %v947_v62 = vsub.s32 (!%p462_p3), 0, %v946_v61  ;;  %vm957_vm4 = vcmp.gt.s32.totalorder (!%p462_p3), %v956_v0, %v946_v61 }
   0xb   : > { %v1545_v32 = vld [vmem:[%s2160_s3] ss:$0 sm:$0xff] (!%p462_p3)  ;;  %v1546_v36 = vld [vmem:[%s2160_s3 + $0x1] ss:$0 sm:$0xff] (!%p462_p3) }
   0xc   : > { %1639 = vmatpush3.bf16.msra.mxu0 (!%p462_p3), %v1778_v3  ;;  %v1561_v43 = vld [vmem:[%s2164_s7] ss:$0 sm:$0xff] (!%p462_p3)  ;;  %v1562_v44 = vld [vmem:[%s2164_s7 + $0x1] ss:$0 sm:$0xff] (!%p462_p3) }
   0xd   : > { %1647 = vmatpush3.bf16.msra.mxu1 (!%p462_p3), %v1779_v4  ;;  %1652 = vmatprep.subr.bf16.mxu0 (!%p462_p3), %v1838_v1 }
   0xe   : > { %s2177_s29 = smov (!%p525_p4, %s1828_s29), 1  ;;  %1660 = vmatprep.subr.bf16.mxu1 %v1838_v1 }
   0xf   : > { %s1957_s25 = sshll.u32 %s2177_s29, 2  ;;  %s538_s17 = scalar_lea.vmem %s2169_s12, %s2177_s29 }
  0x10   : > { %s531_s18 = scalar_lea.vmem %s2157_s0, %s1957_s25  ;;  %s535_s28 = scalar_lea.vmem %s2158_s1, %s1957_s25  ;;  %v941_v60 = vld [vmem:[%s538_s17] sm:$0x1] }
  0x11   : > { %v1970_v7 = vld [vmem:[%s531_s18] sm:$0xf]  ;;  %vm942_vm3 = vcmp.gt.f32.partialorder %v941_v60, 0.5  ;;  %s1543_s19 = sshll.u32 %s2177_s29, 3  ;;  %s552_s17 = scalar_lea.vmem %s2171_s14, %s1957_s25 }
  0x12   : > { %1641 = vmatmul.mubr.msk.bf16.vlgmr.msra.gmra.mrb[0].mxu0 %vm590_vm1, %v1970_v7  ;;  %1649 = vmatmul.mubr.msk.bf16.vlgmr.msra.gmra.mrb[0].mxu1 %vm590_vm1, %v1970_v7  ;;  %v555_v10 = vld [vmem:[%s535_s28] sm:$0xf]  ;;  %v943_v63 = vsel %vm942_vm3, -1e+30, %v1838_v1  ;;  %s545_s22 = scalar_lea.vmem %s2170_s13, %s1543_s19 }
  0x13   : > { %1653 = vmatpush3.bf16.msra.mxu0 %v1780_v5  ;;  %1661 = vmatpush3.bf16.msra.mxu1 %v1781_v6  ;;  %v948_v2 = vrot.slane %v943_v63, %v947_v62 }
  0x14   : > { %1654 = vmatprep.subr.bf16.mxu0 %v1838_v1  ;;  %1662 = vmatprep.subr.bf16.mxu1 %v1838_v1 }
  0x15   : > { %1656 = vmatprep.mubr.msk.bf16.mxu0 %vm1839_vm0, %v1838_v1  ;;  %1664 = vmatprep.mubr.msk.bf16.mxu1 %vm1839_vm0, %v1838_v1  ;;  %v958_v3 = vsel %vm957_vm4, -1e+30, %v948_v2 }
  0x17   : > { %1655 = vmatpush3.bf16.msra.mxu0 %v1782_v8  ;;  %1663 = vmatpush3.bf16.msra.mxu1 %v1783_v9 }
  0x18   : > { %1668 = vmatprep.subr.bf16.mxu0 %v1838_v1  ;;  %1676 = vmatprep.subr.bf16.mxu1 %v1838_v1 }
  0x1a   : > { %1657 = vmatmul.mubr.msk.bf16.vlgmr.msra.gmra.mrb[4].mxu0 %vm590_vm1, %v555_v10  ;;  %1665 = vmatmul.mubr.msk.bf16.vlgmr.msra.gmra.mrb[4].mxu1 %vm590_vm1, %v555_v10 }
  0x1b   : > { %1672 = vmatprep.mubr.msk.bf16.mxu0 %vm1839_vm0, %v1838_v1  ;;  %1680 = vmatprep.mubr.msk.bf16.mxu1 %vm1839_vm0, %v1838_v1 }
  0x1c   : > { %1669 = vmatpush3.bf16.msra.mxu0 %v1784_v11  ;;  %1677 = vmatpush3.bf16.msra.mxu1 %v1785_v12 }
  0x1d   : > { %1670 = vmatprep.subr.bf16.mxu0 %v1838_v1  ;;  %1678 = vmatprep.subr.bf16.mxu1 %v1838_v1 }
  0x20   : > { %1671 = vmatpush3.bf16.msra.mxu0 %v1786_v13  ;;  %1679 = vmatpush3.bf16.msra.mxu1 %v1787_v14 }
  0x21   : > { %1684 = vmatprep.subr.bf16.mxu0 %v1838_v1  ;;  %1690 = vmatprep.subr.bf16.mxu1 %v1838_v1 }
  0x23   : > { %1673 = vmatmul.mubr.msk.bf16.vlgmr.msra.gmra.mrb[8].mxu0 %vm590_vm1, %v555_v10  ;;  %1681 = vmatmul.mubr.msk.bf16.vlgmr.msra.gmra.mrb[8].mxu1 %vm590_vm1, %v555_v10 }
  0x24   : > { %1686 = vmatprep.mubr.msk.bf16.mxu0 %vm1839_vm0, %v1838_v1  ;;  %1692 = vmatprep.mubr.msk.bf16.mxu1 %vm1839_vm0, %v1838_v1 }
  0xe5   : > { %v628_v15 = vpop.f32.mrb[0].mxu0  ;;  %v680_v17 = vpop.f32.mrb[0].mxu1 }
  0xe6   : > { %v1642_v16 = vpop.f32.mrb[1].mxu0  ;;  %v1650_v19 = vpop.f32.mrb[1].mxu1  ;;  %v629_v39 = vadd.f32 %v1545_v32, %v628_v15  ;;  %v681_v40 = vadd.f32 %v1546_v36, %v680_v17  ;;  %v1790_v36 = vld [vmem:[%s2165_s8 + $0x40] sm:$0xff]  }
  0xe7   : > { %v631_v18 = vpop.f32.mrb[2].mxu0  ;;  %v683_v21 = vpop.f32.mrb[2].mxu1 }
  0xe8   : > { %v1643_v20 = vpop.f32.mrb[3].mxu0  ;;  %v1651_v22 = vpop.f32.mrb[3].mxu1  ;;  %v959_v41 = vpack.c.bf16 %v629_v39, %v629_v39  ;;  %v960_v42 = vpack.c.bf16 %v681_v40, %v681_v40  ;;  %v1792_v39 = vld [vmem:[%s2165_s8 + $0x48] sm:$0xff]   ;;  %v1793_v40 = vld [vmem:[%s2165_s8 + $0x18] sm:$0xff]  }
  0xed   : > { %v757_v25 = vpop.f32.mrb[4].mxu0  ;;  %v809_v27 = vpop.f32.mrb[4].mxu1 }
  0xee   : > { %v758_v26 = vadd.f32 %v1553_v23, %v757_v25  ;;  %v1658_v28 = vpop.f32.mrb[5].mxu0  ;;  %v810_v29 = vadd.f32 %v1554_v24, %v809_v27  ;;  %v1666_v31 = vpop.f32.mrb[5].mxu1 }
  0xef   : > { %v760_v30 = vpop.f32.mrb[6].mxu0  ;;  %v812_v35 = vpop.f32.mrb[6].mxu1  ;;  %v1788_v31 = vld [vmem:[%s2165_s8] sm:$0xff]  }
  0xf0   : > { %v961_v33 = vpack.c.bf16 %v758_v26, %v758_v26  ;;  %v1659_v34 = vpop.f32.mrb[7].mxu0  ;;  %v962_v37 = vpack.c.bf16 %v810_v29, %v810_v29  ;;  %v1667_v38 = vpop.f32.mrb[7].mxu1  ;;  %v1789_v35 = vld [vmem:[%s2165_s8 + $0x8] sm:$0xff]  }
  0xf1   : > { %v1791_v38 = vld [vmem:[%s2165_s8 + $0x10] sm:$0xff]  }
  0xf2   : > { %1685 = vmatpush3.bf16.xpose.msra.mxu0 %v961_v33  ;;  %1691 = vmatpush3.bf16.xpose.msra.mxu1 %v962_v37 }
  0xf3   : > { %1696 = vmatprep.subr.bf16.mxu0 %v1838_v1  ;;  %1702 = vmatprep.subr.bf16.mxu1 %v1838_v1 }
  0xf6   : > { %v883_v45 = vpop.f32.mrb[8].mxu0  ;;  %v935_v46 = vpop.f32.mrb[8].mxu1 }
  0xf7   : > { %v884_v47 = vadd.f32 %v1561_v43, %v883_v45  ;;  %v1674_v48 = vpop.f32.mrb[9].mxu0  ;;  %v936_v49 = vadd.f32 %v1562_v44, %v935_v46  ;;  %v1682_v50 = vpop.f32.mrb[9].mxu1  ;;  %v1796_v43 = vld [vmem:[%s2165_s8 + $0x58] sm:$0xff]   ;;  %v1797_v44 = vld [vmem:[%s2165_s8 + $0x28] sm:$0xff]   ;;  %v1798_v45 = vld [vmem:[%s2165_s8 + $0x60] sm:$0xff]  }
  0xf8   : > { %v886_v51 = vpop.f32.mrb[10].mxu0  ;;  %v938_v52 = vpop.f32.mrb[10].mxu1  ;;  %v1799_v46 = vld [vmem:[%s2165_s8 + $0x30] sm:$0xff]   ;;  %v1801_v48 = vld [vmem:[%s2165_s8 + $0x38] sm:$0xff]  }
  0xf9   : > { %1687 = vmatmul.mubr.bf16.vlgmr.msra.gmra.mrb[12].mxu0 %v959_v41  ;;  %1693 = vmatmul.mubr.bf16.vlgmr.msra.gmra.mrb[12].mxu1 %v960_v42  ;;  %v1068_v53 = vpack.c.bf16 %v884_v47, %v884_v47  ;;  %v1675_v54 = vpop.f32.mrb[11].mxu0  ;;  %v1069_v55 = vpack.c.bf16 %v936_v49, %v936_v49  ;;  %v1683_v56 = vpop.f32.mrb[11].mxu1  ;;  %v1794_v41 = vld [vmem:[%s2165_s8 + $0x50] sm:$0xff]   ;;  %v1795_v42 = vld [vmem:[%s2165_s8 + $0x20] sm:$0xff]   ;;  %v1800_v47 = vld [vmem:[%s2165_s8 + $0x68] sm:$0xff]  }
  0xfa   : > { %1698 = vmatprep.mubr.msk.bf16.mxu0 %vm1839_vm0, %v1838_v1  ;;  %1704 = vmatprep.mubr.msk.bf16.mxu1 %vm1839_vm0, %v1838_v1  ;;  %v1802_v49 = vld [vmem:[%s2165_s8 + $0x70] sm:$0xff]   ;;  %v1803_v50 = vld [vmem:[%s2165_s8 + $0x78] sm:$0xff]  }
  0xfb   : > { %v1075_v57 = vsel %vm1073_vm2, %v1068_v53, 0  ;;  %v1121_v58 = vsel %vm1073_vm2, %v1069_v55, 0 }
  0xfc   : > { %1697 = vmatpush3.bf16.msra.mxu0 %v1075_v57  ;;  %1703 = vmatpush3.bf16.msra.mxu1 %v1121_v58 }
  0xfd   : > { %1708 = vmatprep.subr.bf16.mxu0 %v1838_v1  ;;  %1728 = vmatprep.subr.bf16.mxu1 %v1838_v1 }
 0x1cc   : > { %v997_v4 = vpop.f32.mrb[12].mxu0  ;;  %v1037_v6 = vpop.f32.mrb[12].mxu1 }
 0x1cd   : > { %v998_v5 = vadd.f32 %v997_v4, %v958_v3  ;;  %v1688_v8 = vpop.f32.mrb[13].mxu0  ;;  %v1694_v9 = vpop.f32.mrb[13].mxu1  ;;  %v1038_v11 = vadd.f32 %v1037_v6, %v958_v3  ;;  %v1587_v4 = vld [vmem:[%s2166_s9] ss:$0 sm:$0xff] }
 0x1ce   : > { %v1000_v10 = vpop.f32.mrb[14].mxu0  ;;  %v1040_v12 = vpop.f32.mrb[14].mxu1  ;;  %v1384_v9 = vunpack.c.l.bf16 %v1970_v7 }
 0x1cf   : > { %v1689_v13 = vpop.f32.mrb[15].mxu0  ;;  %v1044_v14 = vsel %vm1043_vm5, %v998_v5, -inf  ;;  %v1695_v15 = vpop.f32.mrb[15].mxu1  ;;  %v1047_v16 = vsel %vm1043_vm5, %v1038_v11, -inf }
 0x1d0   : > { %1045 = vmax.xlane.f32.xlu0 %v1044_v14  ;;  %v1840_v14 = vmov 0   ;;  %v1416_v15 = vld [vmem:[%s545_s22] sm:$0xff] }
 0x1d1   : > { %1775 = vset.pattern.permute.xlu0 %v1840_v14 }
 0x1d4   : > { %1048 = vmax.xlane.f32.xlu0 %v1047_v16 }
 0x25d   : > { %v1046_v17 = vpop.xlane.xlu0 %1045 }
 0x25e   : > { %v1050_v18 = vsub.f32 %v998_v5, %v1046_v17 }
 0x260   : > { %v1052_v19 = vmul.f32 1.442695, %v1050_v18 }
 0x261   : > { %v1049_v20 = vpop.xlane.xlu0 %1048 }
 0x262   : > { %1804 = vpow2.f32 %v1052_v19  ;;  %v1051_v21 = vsub.f32 %v1038_v11, %v1049_v20 }
 0x264   : > { %v1054_v22 = vmul.f32 1.442695, %v1051_v21 }
 0x266   : > { %1806 = vpow2.f32 %v1054_v22 }
 0x26c   : > { %v1805_v23 = vpop.eup %1804 }
 0x26d   : > { %v1056_v24 = vsel %vm1043_vm5, %v1805_v23, 0.0 }
 0x26e   : > { %1057 = vadd.xlane.f32.xlu1 %v1056_v24  ;;  %v1588_v24 = vld [vmem:[%s2167_s10] ss:$0 sm:$0xff] }
 0x270   : > { %v1807_v25 = vpop.eup %1806 }
 0x271   : > { %v1059_v26 = vsel %vm1043_vm5, %v1807_v25, 0.0 }
 0x272   : > { %1060 = vadd.xlane.f32.xlu1 %v1059_v26  ;;  %v1589_v26 = vld [vmem:[%s2168_s11] ss:$0 sm:$0xff] }
 0x2fb   : > { %v1058_v27 = vpop.xlane.xlu1 %1057 }
 0x2fc   : > { %1808 = vrcp.f32 %v1058_v27 }
 0x2ff   : > { %v1061_v28 = vpop.xlane.xlu1 %1060 }
 0x300   : > { %1810 = vrcp.f32 %v1061_v28 }
 0x306   : > { %v1809_v29 = vpop.eup %1808 }
 0x307   : > { %v1064_v30 = vmul.f32 %v1809_v29, %v1805_v23 }
 0x309   : > { %v1066_v32 = vpack.c.bf16 %v1064_v30, %v1064_v30 }
 0x30a   : > { %v1811_v33 = vpop.eup %1810 }
 0x30b   : > { %v1065_v34 = vmul.f32 %v1811_v33, %v1807_v25  ;;  %1699 = vmatmul.mubr.msk.bf16.vlgmr.msra.gmra.mrb[16].mxu0 %vm1043_vm5, %v1066_v32 }
 0x30c   : > { %1709 = vmatpush3.bf16.msra.mxu0 %v1788_v31  ;;  %1724 = vmatprep.mubr.msk.bf16.mxu0 %vm1839_vm0, %v1838_v1 }
 0x30d   : > { %v1067_v37 = vpack.c.bf16 %v1065_v34, %v1065_v34  ;;  %1710 = vmatprep.subr.bf16.mxu0 %v1838_v1 }
 0x30f   : > { %1705 = vmatmul.mubr.msk.bf16.vlgmr.msra.gmra.mrb[16].mxu1 %vm1043_vm5, %v1067_v37 }
 0x310   : > { %1711 = vmatpush3.bf16.msra.mxu0 %v1789_v35  ;;  %1729 = vmatpush3.bf16.msra.mxu1 %v1790_v36 }
 0x311   : > { %1712 = vmatprep.subr.bf16.mxu0 %v1838_v1  ;;  %1730 = vmatprep.subr.bf16.mxu1 %v1838_v1 }
 0x312   : > { %1744 = vmatprep.mubr.msk.bf16.mxu1 %vm1839_vm0, %v1838_v1 }
 0x314   : > { %1713 = vmatpush3.bf16.msra.mxu0 %v1791_v38  ;;  %1731 = vmatpush3.bf16.msra.mxu1 %v1792_v39 }
 0x315   : > { %1714 = vmatprep.subr.bf16.mxu0 %v1838_v1  ;;  %1732 = vmatprep.subr.bf16.mxu1 %v1838_v1 }
 0x318   : > { %1715 = vmatpush3.bf16.msra.mxu0 %v1793_v40  ;;  %1733 = vmatpush3.bf16.msra.mxu1 %v1794_v41 }
 0x319   : > { %1716 = vmatprep.subr.bf16.mxu0 %v1838_v1  ;;  %1734 = vmatprep.subr.bf16.mxu1 %v1838_v1 }
 0x31c   : > { %1717 = vmatpush3.bf16.msra.mxu0 %v1795_v42  ;;  %1735 = vmatpush3.bf16.msra.mxu1 %v1796_v43 }
 0x31d   : > { %1718 = vmatprep.subr.bf16.mxu0 %v1838_v1  ;;  %1736 = vmatprep.subr.bf16.mxu1 %v1838_v1 }
 0x320   : > { %1719 = vmatpush3.bf16.msra.mxu0 %v1797_v44  ;;  %1737 = vmatpush3.bf16.msra.mxu1 %v1798_v45 }
 0x321   : > { %1720 = vmatprep.subr.bf16.mxu0 %v1838_v1  ;;  %1738 = vmatprep.subr.bf16.mxu1 %v1838_v1 }
 0x324   : > { %1721 = vmatpush3.bf16.msra.mxu0 %v1799_v46  ;;  %1739 = vmatpush3.bf16.msra.mxu1 %v1800_v47 }
 0x325   : > { %1722 = vmatprep.subr.bf16.mxu0 %v1838_v1  ;;  %1740 = vmatprep.subr.bf16.mxu1 %v1838_v1 }
 0x328   : > { %1723 = vmatpush3.bf16.msra.mxu0 %v1801_v48  ;;  %1741 = vmatpush3.bf16.msra.mxu1 %v1802_v49 }
 0x329   : > { %1742 = vmatprep.subr.bf16.mxu1 %v1838_v1 }
 0x32c   : > { %1743 = vmatpush3.bf16.msra.mxu1 %v1803_v50 }
 0x3de   : > { %v1111_v51 = vpop.f32.mrb[16].mxu0 }
 0x3df   : > { %v1163_v52 = vpack.c.bf16 %v1111_v51, %v1111_v51  ;;  %v1700_v53 = vpop.f32.mrb[17].mxu0 }
 0x3e0   : > { %v1114_v54 = vpop.f32.mrb[18].mxu0 }
 0x3e1   : > { %v1701_v55 = vpop.f32.mrb[19].mxu0  ;;  %1725 = vmatmul.mubr.bf16.vlgmr.msra.gmra.mrb[20].mxu0 %v1163_v52 }
 0x3e2   : > { %v1157_v56 = vpop.f32.mrb[16].mxu1 }
 0x3e3   : > { %v1164_v57 = vpack.c.bf16 %v1157_v56, %v1157_v56  ;;  %v1706_v58 = vpop.f32.mrb[17].mxu1 }
 0x3e4   : > { %v1160_v59 = vpop.f32.mrb[18].mxu1 }
 0x3e5   : > { %v1707_v60 = vpop.f32.mrb[19].mxu1  ;;  %1745 = vmatmul.mubr.bf16.vlgmr.msra.gmra.mrb[20].mxu1 %v1164_v57 }
 0x4b4   : > { %v1279_v61 = vpop.f32.mrb[20].mxu0 }
 0x4b5   : > { %v1726_v62 = vpop.f32.mrb[21].mxu0  ;;  %v1373_v2 = vsel %vm590_vm1, %v1279_v61, 0.0 }
 0x4b6   : > { %v1282_v1 = vpop.f32.mrb[22].mxu0 }
 0x4b7   : > { %v1727_v63 = vpop.f32.mrb[23].mxu0 }
 0x4b8   : > { %v1367_v0 = vpop.f32.mrb[20].mxu1 }
 0x4b9   : > { %v1374_v3 = vsel %vm590_vm1, %v1367_v0, 0.0  ;;  %v1746_v5 = vpop.f32.mrb[21].mxu1 }
 0x4ba   : > { %v1375_v6 = vadd.f32 %v1374_v3, %v1373_v2  ;;  %v1370_v8 = vpop.f32.mrb[22].mxu1 }
 0x4bb   : > { %v1747_v10 = vpop.f32.mrb[23].mxu1 }
 0x4bc   : > { %v1383_v11 = vadd.f32 %v1587_v4, %v1375_v6 }
 0x4be   : > { %v1385_v12 = vadd.f32 %v1384_v9, %v1383_v11 }
 0x4c0   : > { %v1388_v13 = vsel %vm590_vm1, %v1385_v12, 0.0 }
 0x4c1   : > { %1389 = vadd.xlane.f32.xlu0 %v1388_v13 }
 0x4d7   : > { %1419 = vperm.xlu0 %1775, %v1416_v15  }
 0x54e   : > { %v1390_v16 = vpop.xlane.xlu0 %1389 }
 0x54f   : > { %v1392_v17 = vmul.f32 0.03125, %v1390_v16 }
 0x551   : > { %v1393_v18 = vsub.f32 %v1385_v12, %v1392_v17 }
 0x553   : > { %v1394_v7 = vmul.f32 %v1393_v18, %v1393_v18 }
 0x555   : > { %v1395_v19 = vsel %vm590_vm1, %v1394_v7, 0.0 }
 0x556   : > { %1396 = vadd.xlane.f32.xlu1 %v1395_v19  ;;  %v1420_v28 = vpop.permute.xlu0 %1419 }
 0x5e3   : > { %v1397_v20 = vpop.xlane.xlu1 %1396 }
 0x5e4   : > { %v1398_v21 = vmul.f32 0.03125, %v1397_v20 }
 0x5e6   : > { %v1399_v22 = vadd.f32 1e-05, %v1398_v21 }
 0x5e8   : > { %1812 = vrsqrt.f32 %v1399_v22 }
 0x5f2   : > { %v1813_v23 = vpop.eup %1812 }
 0x5f3   : > { %v1401_v25 = vmul.f32 %v1813_v23, %v1393_v18 }
 0x5f5   : > { %v1408_v27 = vmul.f32 %v1588_v24, %v1401_v25 }
 0x5f7   : > { %v1415_v29 = vadd.f32 %v1589_v26, %v1408_v27 }
 0x5f9   : > { %v1422_v30 = vmul.f32 %v1420_v28, %v1415_v29 }
 0x5fb   : > { %v1423_v31 = vpack.c.bf16 %v1422_v30, %v1422_v30 }
 0x5fd   : > { %1425 = vst.msk [vmem:[%s552_s17] sm:$0xf] %vm1424_vm6, %v1423_v31 }
 0x5fe PF: > { %s24_s15 = sadd.s32 1, %s1836_s15   ;;  %s2172_s29 = smov %s1832_s30 }
 0x5ff   : > { %p21_p5 = scmp.ge.s32.totalorder %s24_s15, 4   ;;  %s2173_s30 = smov %s2175_s16 }
 0x601   :  { %23 = sbr.rel (!%p21_p5) target bundleno = 2 (0x2), region = 115 }

</bundles_post_ra>
